<compile_context>
chip_gen: v5e
topology: v5e:2x2
jax: 0.10.0
libtpu: 0.0.40
codegen_flags: <defaults>
</compile_context>

<pallas_src>
import jax
import jax.numpy as jnp
from jax.experimental import pallas as pl
from jax.experimental.pallas import tpu as pltpu


# ----------------------------- fused Pallas kernel ---------------------------

def make_kernel(B, T):
    """Build the fused GAT -> TCN -> MLP kernel for static (B, T)."""

    def fused_kernel(x_ref, rmat_ref, stil_ref, mmat_ref, bgat_ref,
                     wp_ref, wc_ref, wn_ref, bconv_ref,
                     w1_ref, b1_ref, w2_ref, b2_ref, o_ref):
        """All intermediates stay on-chip.

        x_ref     : (B*T, C)   f32   node scalar values, row = b*T + t
        rmat_ref  : (C, C*H)   bf16  R[c, i*H+h] = (c==i) * d[h]
        stil_ref  : (1, C*H)   f32   s tiled over destination nodes
        mmat_ref  : (C*H, C*G) bf16  head-concat projection
        bgat_ref  : (1, C*G)   f32   GAT bias tiled over nodes
        wp/wc/wn  : (C*G, C*O) bf16  block-diag conv tap weights (t-1, t, t+1)
        bconv_ref : (1, C*O)   f32   conv bias tiled over nodes
        w1_ref    : (C*O, MLP_H) bf16  MLP layer1 with BN(eval) folded in
        b1_ref    : (1, MLP_H) f32
        w2_ref    : (MLP_H, LATENT) bf16
        b2_ref    : (1, LATENT) f32
        o_ref     : (B, LATENT) f32
        """
        bf16 = jnp.bfloat16
        f32 = jnp.float32
        x = x_ref[...]                                                  # (BT, C) f32

        # ---------------- GAT: all heads / all destination nodes at once -----
        # k = i*H + h ;  e[t, j, k] = d[h]*x[t,i] + s[h]*x[t,j]
        a_dst = jnp.dot(x.astype(bf16), rmat_ref[...],
                        preferred_element_type=f32)                     # (BT, K)
        e = a_dst[:, None, :] + x[:, :, None] * stil_ref[...]           # (BT, Cj, K)
        e = jnp.where(e >= 0.0, e, 0.2 * e)                             # LeakyReLU(0.2)
        e = e - jnp.max(e, axis=1, keepdims=True)                       # stable softmax over j
        p = jnp.exp(e)
        att = p * pl.reciprocal(jnp.sum(p, axis=1, keepdims=True), approx=True)
        z = jnp.sum(att * x[:, :, None], axis=1)                        # (BT, K) f32

        # head-concat projection + bias + ELU, lane-dense (BT, C*G)
        feat = jnp.dot(z.astype(bf16), mmat_ref[...],
                       preferred_element_type=f32) + bgat_ref[...]
        feat = jnp.where(feat > 0.0, feat, jnp.exp(jnp.minimum(feat, 0.0)) - 1.0)

        # ---------------- TCN: conv1d(k=3, pad=1) as three tap matmuls -------
        fb = feat.astype(bf16)                                          # resident in vregs
        ya = jnp.dot(fb, wp_ref[...], preferred_element_type=f32)       # tap @ t-1
        yb = jnp.dot(fb, wc_ref[...], preferred_element_type=f32)       # tap @ t
        yc = jnp.dot(fb, wn_ref[...], preferred_element_type=f32)       # tap @ t+1

        # shift tap outputs in time; zero the per-batch boundary rows
        zero = jnp.zeros_like(ya[0:1])
        row = jax.lax.broadcasted_iota(jnp.int32, (B * T, 1), 0)
        ya_sh = jnp.where(row % T == 0, 0.0,
                          jnp.concatenate([zero, ya[:-1]], axis=0))     # y[t] += ya[t-1]
        yc_sh = jnp.where(row % T == (T - 1), 0.0,
                          jnp.concatenate([yc[1:], zero], axis=0))      # y[t] += yc[t+1]
        y = ya_sh + yb + yc_sh + bconv_ref[...]
        y = jnp.where(y >= 0.0, y, 0.01 * y)                            # LeakyReLU(0.01)

        # per-batch time mean -> (B, C*O) readout (BN(eval) folded into w1/b1)
        r_parts = [jnp.sum(y[b * T:(b + 1) * T], axis=0, keepdims=True)
                   for b in range(B)]
        r = jnp.concatenate(r_parts, axis=0) * (1.0 / T)                # (B, C*O)

        # ---------------- MLP head -------------------------------------------
        h = jnp.dot(r.astype(bf16), w1_ref[...],
                    preferred_element_type=f32) + b1_ref[...]
        h = jnp.where(h >= 0.0, h, 0.01 * h)
        o_ref[...] = jnp.dot(h.astype(bf16), w2_ref[...],
                             preferred_element_type=f32) + b2_ref[...]

    return fused_kernel


# ----------------------------- host-side packing (call ONCE) -----------------

def pack_params(p, num_channels):
    """Precompute packed / bf16 weights outside the jitted forward path."""
    f32, bf16 = jnp.float32, jnp.bfloat16
    C = num_channels
    H, F = p["w_gat"].shape
    G = H * F
    O = p["b_conv"].shape[0]
    K, CG, CO = C * H, C * G, C * O

    s = jnp.sum(p["w_gat"] * p["att_src"], axis=1)                       # (H,)
    d = jnp.sum(p["w_gat"] * p["att_dst"], axis=1)                       # (H,)
    eye_c = jnp.eye(C, dtype=f32)
    r_mat = (eye_c[:, :, None] * d[None, None, :]).reshape(C, K)         # R[c,i*H+h]=(c==i)d[h]
    s_til = jnp.tile(s, C).reshape(1, K)
    w_exp = (jnp.eye(H, dtype=f32)[:, :, None] * p["w_gat"][None, :, :]).reshape(H, G)
    m_mat = (eye_c[:, None, :, None] * w_exp[None, :, None, :]).reshape(K, CG)
    bg_til = jnp.tile(p["b_gat"], C).reshape(1, CG)

    # per-tap block-diagonal conv weights: Wtap[c*G+g, c*O+o] = w_conv[o, g, tap]
    # (kept block-diagonal for a lane-dense single matmul per tap; bf16 halves DMA)
    wt = jnp.transpose(p["w_conv"], (2, 1, 0))                           # (3, G, O)
    taps = [(eye_c[:, None, :, None] * wt[t][None, :, None, :]).reshape(CG, CO)
            for t in range(3)]
    bc_til = jnp.tile(p["b_conv"], C).reshape(1, CO)

    # fold BN(eval) affine (commutes with the time mean) into MLP layer 1
    eps = 1e-5
    bn_scale = p["gamma"] * jax.lax.rsqrt(p["run_var"] + eps)
    bn_shift = p["beta"] - p["run_mean"] * bn_scale
    sc_til = jnp.tile(bn_scale, C)                                       # (CO,)
    sh_til = jnp.tile(bn_shift, C)                                       # (CO,)
    w1t = p["w1"].T                                                      # (CO, MLP_H)
    w1_eff = sc_til[:, None] * w1t
    b1_eff = (sh_til @ w1t + p["b1"]).reshape(1, -1)
    w2t = p["w2"].T
    b2 = p["b2"].reshape(1, -1)

    return dict(
        r_mat=r_mat.astype(bf16), s_til=s_til.astype(f32),
        m_mat=m_mat.astype(bf16), bg_til=bg_til.astype(f32),
        w_tap0=taps[0].astype(bf16), w_tap1=taps[1].astype(bf16),
        w_tap2=taps[2].astype(bf16), bc_til=bc_til.astype(f32),
        w1_eff=w1_eff.astype(bf16), b1_eff=b1_eff.astype(f32),
        w2t=w2t.astype(bf16), b2=b2.astype(f32),
    )


# ----------------------------- jitted forward ---------------------------------

def eeg_to_latent_forward(x, q):
    """Forward pass equivalent to EEGToLatentGAT.forward (inference mode)."""
    B, C, T = x.shape
    K = q["r_mat"].shape[1]
    CG = q["m_mat"].shape[1]
    CO = q["w_tap0"].shape[1]
    MLP_H = q["w1_eff"].shape[1]
    LATENT = q["w2t"].shape[1]
    BT = B * T

    # only per-call host work: the tiny (B,T,C) permute + flatten
    x2d = jnp.transpose(x, (0, 2, 1)).reshape(BT, C)

    def full(*shape):
        return pl.BlockSpec(shape, lambda i: (0,) * len(shape))

    return pl.pallas_call(
        make_kernel(B, T),
        grid=(1,),                                                       # single batched step
        in_specs=[
            pl.BlockSpec((BT, C), lambda i: (0, 0)),                     # x
            full(C, K), full(1, K), full(K, CG), full(1, CG),            # GAT params
            full(CG, CO), full(CG, CO), full(CG, CO), full(1, CO),       # TCN tap params
            full(CO, MLP_H), full(1, MLP_H),                             # MLP (BN folded)
            full(MLP_H, LATENT), full(1, LATENT),
        ],
        out_specs=pl.BlockSpec((B, LATENT), lambda i: (0, 0)),
        out_shape=jax.ShapeDtypeStruct((B, LATENT), jnp.float32),
        compiler_params=pltpu.CompilerParams(dimension_semantics=("arbitrary",)),
    )(x2d, q["r_mat"], q["s_til"], q["m_mat"], q["bg_til"],
      q["w_tap0"], q["w_tap1"], q["w_tap2"], q["bc_til"],
      q["w1_eff"], q["b1_eff"], q["w2t"], q["b2"])


# ----------------------------- pure-JAX reference ----------------------------

def reference_forward(x, p):
    hi = jax.lax.Precision.HIGHEST
    B, C, T = x.shape
    H, F = p["w_gat"].shape
    G = H * F
    O = p["b_conv"].shape[0]
    xt = jnp.transpose(x, (0, 2, 1))                                     # (B, T, C)
    s = jnp.sum(p["w_gat"] * p["att_src"], axis=1)
    d = jnp.sum(p["w_gat"] * p["att_dst"], axis=1)
    a_src = xt[..., None] * s                                            # (B,T,C,H)
    a_dst = xt[..., None] * d
    e = a_dst[:, :, :, None, :] + a_src[:, :, None, :, :]                # (B,T,Ci,Cj,H)
    e = jnp.where(e >= 0, e, 0.2 * e)
    att = jax.nn.softmax(e, axis=3)
    z = jnp.einsum("btijh,btj->btih", att, xt, precision=hi)             # (B,T,C,H)
    feat = z[..., None] * p["w_gat"][None, None, None] + p["b_gat"].reshape(H, F)
    feat = feat.reshape(B, T, C, G)
    feat = jnp.where(feat > 0, feat, jnp.exp(jnp.minimum(feat, 0.0)) - 1.0)
    xs = jnp.transpose(feat, (0, 2, 1, 3))                               # (B,C,T,G)
    xp = jnp.pad(xs, ((0, 0), (0, 0), (1, 1), (0, 0)))
    w = p["w_conv"]                                                      # (O,G,3)
    y = (jnp.einsum("bctg,og->bcto", xp[:, :, 0:T, :], w[:, :, 0], precision=hi)
         + jnp.einsum("bctg,og->bcto", xp[:, :, 1:T + 1, :], w[:, :, 1], precision=hi)
         + jnp.einsum("bctg,og->bcto", xp[:, :, 2:T + 2, :], w[:, :, 2], precision=hi))
    y = y + p["b_conv"]
    y = jnp.where(y >= 0, y, 0.01 * y)
    eps = 1e-5
    scale = p["gamma"] / jnp.sqrt(p["run_var"] + eps)
    shift = p["beta"] - p["run_mean"] * scale
    y = y * scale + shift
    r = jnp.mean(y, axis=2).reshape(B, C * O)
    h = jnp.dot(r, p["w1"].T, precision=hi) + p["b1"]
    h = jnp.where(h >= 0, h, 0.01 * h)
    return jnp.dot(h, p["w2"].T, precision=hi) + p["b2"]


# ----------------------------- main -------------------------------------------

if __name__ == "__main__":
    # small, shape-consistent configuration
    B, C, T = 2, 8, 16            # batch, num_channels (graph nodes), sequence_length
    H, F = 4, 8                   # num_gat_heads, gat_hidden_dim
    O = 16                        # tcn_out_channels
    MLP_H, LATENT = 32, 64        # mlp_hidden_dim, latent_dim
    G = H * F

    key = jax.random.PRNGKey(0)
    ks = jax.random.split(key, 14)
    f32 = jnp.float32
    params = {
        "w_gat":   (0.5 * jax.random.normal(ks[0], (H, F))).astype(f32),   # GATConv lin weight (H*F,1)
        "att_src": (0.5 * jax.random.normal(ks[1], (H, F))).astype(f32),
        "att_dst": (0.5 * jax.random.normal(ks[2], (H, F))).astype(f32),
        "b_gat":   (0.1 * jax.random.normal(ks[3], (G,))).astype(f32),
        "w_conv":  (0.1 * jax.random.normal(ks[4], (O, G, 3))).astype(f32),
        "b_conv":  (0.1 * jax.random.normal(ks[5], (O,))).astype(f32),
        "gamma":   (1.0 + 0.1 * jax.random.normal(ks[6], (O,))).astype(f32),
        "beta":    (0.1 * jax.random.normal(ks[7], (O,))).astype(f32),
        "run_mean": jnp.zeros((O,), f32),
        "run_var":  jnp.ones((O,), f32),
        "w1":      (0.1 * jax.random.normal(ks[8], (MLP_H, C * O))).astype(f32),
        "b1":      (0.1 * jax.random.normal(ks[9], (MLP_H,))).astype(f32),
        "w2":      (0.1 * jax.random.normal(ks[10], (LATENT, MLP_H))).astype(f32),
        "b2":      (0.1 * jax.random.normal(ks[11], (LATENT,))).astype(f32),
    }
    x = jax.random.normal(ks[12], (B, C, T), f32)

    packed = pack_params(params, C)          # host packing hoisted out of the jitted path
    fwd = jax.jit(eeg_to_latent_forward)
    out = jax.block_until_ready(fwd(x, packed))
    ref = reference_forward(x, params)

    assert out.shape == (B, LATENT)
    assert bool(jnp.all(jnp.isfinite(out)))
    assert bool(jnp.allclose(out, ref, rtol=1e-2, atol=1e-2)), "kernel/reference mismatch"
    print("KERNEL_OK")
</pallas_src>

<mosaic_0001>
module attributes {stable_mosaic.version = 11 : i64} {
  func.func @fused_kernel(%arg0: i32, %arg1: memref<32x8xf32, #tpu.memory_space<vmem>>, %arg2: memref<8x32xbf16, #tpu.memory_space<vmem>>, %arg3: memref<1x32xf32, #tpu.memory_space<vmem>>, %arg4: memref<32x256xbf16, #tpu.memory_space<vmem>>, %arg5: memref<1x256xf32, #tpu.memory_space<vmem>>, %arg6: memref<256x128xbf16, #tpu.memory_space<vmem>>, %arg7: memref<256x128xbf16, #tpu.memory_space<vmem>>, %arg8: memref<256x128xbf16, #tpu.memory_space<vmem>>, %arg9: memref<1x128xf32, #tpu.memory_space<vmem>>, %arg10: memref<128x32xbf16, #tpu.memory_space<vmem>>, %arg11: memref<1x32xf32, #tpu.memory_space<vmem>>, %arg12: memref<32x64xbf16, #tpu.memory_space<vmem>>, %arg13: memref<1x64xf32, #tpu.memory_space<vmem>>, %arg14: memref<2x64xf32, #tpu.memory_space<vmem>>) attributes {dimension_semantics = [#tpu.dimension_semantics<arbitrary>], iteration_bounds = array<i64: 1>, scalar_prefetch = 0 : i64, scratch_operands = 0 : i64, tpu.core_type = #tpu.core_type<tc>, window_params = [{pipeline_mode = #tpu.pipeline_mode<synchronous>, transform_indices = @transform_0, window_bounds = array<i64: 32, 8>}, {pipeline_mode = #tpu.pipeline_mode<synchronous>, transform_indices = @transform_1, window_bounds = array<i64: 8, 32>}, {pipeline_mode = #tpu.pipeline_mode<synchronous>, transform_indices = @transform_2, window_bounds = array<i64: 1, 32>}, {pipeline_mode = #tpu.pipeline_mode<synchronous>, transform_indices = @transform_3, window_bounds = array<i64: 32, 256>}, {pipeline_mode = #tpu.pipeline_mode<synchronous>, transform_indices = @transform_4, window_bounds = array<i64: 1, 256>}, {pipeline_mode = #tpu.pipeline_mode<synchronous>, transform_indices = @transform_5, window_bounds = array<i64: 256, 128>}, {pipeline_mode = #tpu.pipeline_mode<synchronous>, transform_indices = @transform_6, window_bounds = array<i64: 256, 128>}, {pipeline_mode = #tpu.pipeline_mode<synchronous>, transform_indices = @transform_7, window_bounds = array<i64: 256, 128>}, {pipeline_mode = #tpu.pipeline_mode<synchronous>, transform_indices = @transform_8, window_bounds = array<i64: 1, 128>}, {pipeline_mode = #tpu.pipeline_mode<synchronous>, transform_indices = @transform_9, window_bounds = array<i64: 128, 32>}, {pipeline_mode = #tpu.pipeline_mode<synchronous>, transform_indices = @transform_10, window_bounds = array<i64: 1, 32>}, {pipeline_mode = #tpu.pipeline_mode<synchronous>, transform_indices = @transform_11, window_bounds = array<i64: 32, 64>}, {pipeline_mode = #tpu.pipeline_mode<synchronous>, transform_indices = @transform_12, window_bounds = array<i64: 1, 64>}, {pipeline_mode = #tpu.pipeline_mode<synchronous>, transform_indices = @transform_13, window_bounds = array<i64: 2, 64>}]} {
    %c0 = arith.constant 0 : index
    %c0_0 = arith.constant 0 : index
    %0 = vector.load %arg1[%c0, %c0_0] : memref<32x8xf32, #tpu.memory_space<vmem>>, vector<32x8xf32>
    %1 = arith.truncf %0 : vector<32x8xf32> to vector<32x8xbf16>
    %c0_1 = arith.constant 0 : index
    %c0_2 = arith.constant 0 : index
    %2 = vector.load %arg2[%c0_1, %c0_2] : memref<8x32xbf16, #tpu.memory_space<vmem>>, vector<8x32xbf16>
    %cst = arith.constant dense<0.000000e+00> : vector<32x32xf32>
    %3 = tpu.matmul %1, %2, %cst {dimension_numbers = #tpu.dot_dimension_numbers<[1], [0], [0], [1], [0, 0, 1, 1], [], []>} : vector<32x8xbf16>, vector<8x32xbf16>, vector<32x32xf32> -> vector<32x32xf32>
    %4 = vector.shape_cast %3 : vector<32x32xf32> to vector<32x1x32xf32>
    %5 = vector.shape_cast %0 : vector<32x8xf32> to vector<32x8x1xf32>
    %c0_3 = arith.constant 0 : index
    %c0_4 = arith.constant 0 : index
    %6 = vector.load %arg3[%c0_3, %c0_4] : memref<1x32xf32, #tpu.memory_space<vmem>>, vector<1x32xf32>
    %7 = vector.shape_cast %6 : vector<1x32xf32> to vector<1x1x32xf32>
    %8 = vector.broadcast %5 : vector<32x8x1xf32> to vector<32x8x32xf32>
    %9 = vector.broadcast %7 : vector<1x1x32xf32> to vector<32x8x32xf32>
    %10 = arith.mulf %8, %9 : vector<32x8x32xf32>
    %11 = vector.broadcast %4 : vector<32x1x32xf32> to vector<32x8x32xf32>
    %12 = arith.addf %11, %10 : vector<32x8x32xf32>
    %cst_5 = arith.constant 0.000000e+00 : f32
    %13 = vector.broadcast %cst_5 : f32 to vector<32x8x32xf32>
    %14 = arith.cmpf oge, %12, %13 : vector<32x8x32xf32>
    %cst_6 = arith.constant 2.000000e-01 : f32
    %15 = vector.broadcast %cst_6 : f32 to vector<32x8x32xf32>
    %16 = arith.mulf %15, %12 : vector<32x8x32xf32>
    %17 = arith.select %14, %12, %16 : vector<32x8x32xi1>, vector<32x8x32xf32>
    %cst_7 = arith.constant dense<0xFF800000> : vector<32x32xf32>
    %18 = vector.multi_reduction <maximumf>, %17, %cst_7 [1] : vector<32x8x32xf32> to vector<32x32xf32>
    %19 = vector.shape_cast %18 : vector<32x32xf32> to vector<32x1x32xf32>
    %20 = vector.broadcast %19 : vector<32x1x32xf32> to vector<32x8x32xf32>
    %21 = arith.subf %17, %20 : vector<32x8x32xf32>
    %22 = math.exp %21 : vector<32x8x32xf32>
    %cst_8 = arith.constant dense<0.000000e+00> : vector<32x32xf32>
    %23 = vector.multi_reduction <add>, %22, %cst_8 [1] : vector<32x8x32xf32> to vector<32x32xf32>
    %24 = vector.shape_cast %23 : vector<32x32xf32> to vector<32x1x32xf32>
    %25 = tpu.reciprocal %24 {approx = true} : vector<32x1x32xf32> -> vector<32x1x32xf32>
    %26 = vector.broadcast %25 : vector<32x1x32xf32> to vector<32x8x32xf32>
    %27 = arith.mulf %22, %26 : vector<32x8x32xf32>
    %28 = vector.shape_cast %0 : vector<32x8xf32> to vector<32x8x1xf32>
    %29 = vector.broadcast %28 : vector<32x8x1xf32> to vector<32x8x32xf32>
    %30 = arith.mulf %27, %29 : vector<32x8x32xf32>
    %cst_9 = arith.constant dense<0.000000e+00> : vector<32x32xf32>
    %31 = vector.multi_reduction <add>, %30, %cst_9 [1] : vector<32x8x32xf32> to vector<32x32xf32>
    %32 = arith.truncf %31 : vector<32x32xf32> to vector<32x32xbf16>
    %c0_10 = arith.constant 0 : index
    %c0_11 = arith.constant 0 : index
    %33 = vector.load %arg4[%c0_10, %c0_11] : memref<32x256xbf16, #tpu.memory_space<vmem>>, vector<32x256xbf16>
    %cst_12 = arith.constant dense<0.000000e+00> : vector<32x256xf32>
    %34 = tpu.matmul %32, %33, %cst_12 {dimension_numbers = #tpu.dot_dimension_numbers<[1], [0], [0], [1], [0, 0, 1, 1], [], []>} : vector<32x32xbf16>, vector<32x256xbf16>, vector<32x256xf32> -> vector<32x256xf32>
    %c0_13 = arith.constant 0 : index
    %c0_14 = arith.constant 0 : index
    %35 = vector.load %arg5[%c0_13, %c0_14] : memref<1x256xf32, #tpu.memory_space<vmem>>, vector<1x256xf32>
    %36 = vector.broadcast %35 : vector<1x256xf32> to vector<32x256xf32>
    %37 = arith.addf %34, %36 : vector<32x256xf32>
    %cst_15 = arith.constant 0.000000e+00 : f32
    %38 = vector.broadcast %cst_15 : f32 to vector<32x256xf32>
    %39 = arith.cmpf ogt, %37, %38 : vector<32x256xf32>
    %cst_16 = arith.constant 0.000000e+00 : f32
    %40 = vector.broadcast %cst_16 : f32 to vector<32x256xf32>
    %41 = arith.minimumf %37, %40 : vector<32x256xf32>
    %42 = math.exp %41 : vector<32x256xf32>
    %cst_17 = arith.constant 1.000000e+00 : f32
    %43 = vector.broadcast %cst_17 : f32 to vector<32x256xf32>
    %44 = arith.subf %42, %43 : vector<32x256xf32>
    %45 = arith.select %39, %37, %44 : vector<32x256xi1>, vector<32x256xf32>
    %46 = arith.truncf %45 : vector<32x256xf32> to vector<32x256xbf16>
    %c0_18 = arith.constant 0 : index
    %c0_19 = arith.constant 0 : index
    %47 = vector.load %arg6[%c0_18, %c0_19] : memref<256x128xbf16, #tpu.memory_space<vmem>>, vector<256x128xbf16>
    %cst_20 = arith.constant dense<0.000000e+00> : vector<32x128xf32>
    %48 = tpu.matmul %46, %47, %cst_20 {dimension_numbers = #tpu.dot_dimension_numbers<[1], [0], [0], [1], [0, 0, 1, 1], [], []>} : vector<32x256xbf16>, vector<256x128xbf16>, vector<32x128xf32> -> vector<32x128xf32>
    %c0_21 = arith.constant 0 : index
    %c0_22 = arith.constant 0 : index
    %49 = vector.load %arg7[%c0_21, %c0_22] : memref<256x128xbf16, #tpu.memory_space<vmem>>, vector<256x128xbf16>
    %cst_23 = arith.constant dense<0.000000e+00> : vector<32x128xf32>
    %50 = tpu.matmul %46, %49, %cst_23 {dimension_numbers = #tpu.dot_dimension_numbers<[1], [0], [0], [1], [0, 0, 1, 1], [], []>} : vector<32x256xbf16>, vector<256x128xbf16>, vector<32x128xf32> -> vector<32x128xf32>
    %c0_24 = arith.constant 0 : index
    %c0_25 = arith.constant 0 : index
    %51 = vector.load %arg8[%c0_24, %c0_25] : memref<256x128xbf16, #tpu.memory_space<vmem>>, vector<256x128xbf16>
    %cst_26 = arith.constant dense<0.000000e+00> : vector<32x128xf32>
    %52 = tpu.matmul %46, %51, %cst_26 {dimension_numbers = #tpu.dot_dimension_numbers<[1], [0], [0], [1], [0, 0, 1, 1], [], []>} : vector<32x256xbf16>, vector<256x128xbf16>, vector<32x128xf32> -> vector<32x128xf32>
    %cst_27 = arith.constant 0.000000e+00 : f32
    %53 = vector.broadcast %cst_27 : f32 to vector<1x128xf32>
    %54 = tpu.iota {dimensions = array<i32: 0>} : vector<32x1xi32>
    %c16_i32 = arith.constant 16 : i32
    %c0_i32 = arith.constant 0 : i32
    %55 = arith.cmpi eq, %c16_i32, %c0_i32 : i32
    %c1_i32 = arith.constant 1 : i32
    %56 = arith.select %55, %c1_i32, %c16_i32 : i32
    %57 = vector.broadcast %56 : i32 to vector<32x1xi32>
    %58 = arith.remsi %54, %57 : vector<32x1xi32>
    %c0_i32_28 = arith.constant 0 : i32
    %59 = vector.broadcast %c0_i32_28 : i32 to vector<32x1xi32>
    %60 = arith.cmpi ne, %58, %59 : vector<32x1xi32>
    %c0_i32_29 = arith.constant 0 : i32
    %61 = vector.broadcast %c0_i32_29 : i32 to vector<32x1xi32>
    %62 = arith.cmpi slt, %58, %61 : vector<32x1xi32>
    %c0_i32_30 = arith.constant 0 : i32
    %63 = arith.cmpi slt, %56, %c0_i32_30 : i32
    %64 = vector.broadcast %63 : i1 to vector<32x1xi1>
    %65 = vector.broadcast %64 : vector<32x1xi1> to vector<32x1xi1>
    %66 = arith.xori %62, %65 : vector<32x1xi1>
    %67 = arith.andi %66, %60 : vector<32x1xi1>
    %68 = vector.broadcast %56 : i32 to vector<32x1xi32>
    %69 = arith.addi %58, %68 : vector<32x1xi32>
    %70 = arith.select %67, %69, %58 : vector<32x1xi1>, vector<32x1xi32>
    %c0_i32_31 = arith.constant 0 : i32
    %71 = vector.broadcast %c0_i32_31 : i32 to vector<32x1xi32>
    %72 = arith.cmpi eq, %70, %71 : vector<32x1xi32>
    %73 = vector.extract_strided_slice %48 {offsets = [0, 0], sizes = [31, 128], strides = [1, 1]} : vector<32x128xf32> to vector<31x128xf32>
    %74 = tpu.concatenate %53, %73 in 0 : vector<1x128xf32>, vector<31x128xf32> -> vector<32x128xf32>
    %cst_32 = arith.constant 0.000000e+00 : f32
    %75 = vector.shape_cast %72 : vector<32x1xi1> to vector<32x1xi1>
    %76 = vector.broadcast %75 : vector<32x1xi1> to vector<32x128xi1>
    %77 = vector.broadcast %cst_32 : f32 to vector<32x128xf32>
    %78 = arith.select %76, %77, %74 : vector<32x128xi1>, vector<32x128xf32>
    %c16_i32_33 = arith.constant 16 : i32
    %c0_i32_34 = arith.constant 0 : i32
    %79 = arith.cmpi eq, %c16_i32_33, %c0_i32_34 : i32
    %c1_i32_35 = arith.constant 1 : i32
    %80 = arith.select %79, %c1_i32_35, %c16_i32_33 : i32
    %81 = vector.broadcast %80 : i32 to vector<32x1xi32>
    %82 = arith.remsi %54, %81 : vector<32x1xi32>
    %c0_i32_36 = arith.constant 0 : i32
    %83 = vector.broadcast %c0_i32_36 : i32 to vector<32x1xi32>
    %84 = arith.cmpi ne, %82, %83 : vector<32x1xi32>
    %c0_i32_37 = arith.constant 0 : i32
    %85 = vector.broadcast %c0_i32_37 : i32 to vector<32x1xi32>
    %86 = arith.cmpi slt, %82, %85 : vector<32x1xi32>
    %c0_i32_38 = arith.constant 0 : i32
    %87 = arith.cmpi slt, %80, %c0_i32_38 : i32
    %88 = vector.broadcast %87 : i1 to vector<32x1xi1>
    %89 = vector.broadcast %88 : vector<32x1xi1> to vector<32x1xi1>
    %90 = arith.xori %86, %89 : vector<32x1xi1>
    %91 = arith.andi %90, %84 : vector<32x1xi1>
    %92 = vector.broadcast %80 : i32 to vector<32x1xi32>
    %93 = arith.addi %82, %92 : vector<32x1xi32>
    %94 = arith.select %91, %93, %82 : vector<32x1xi1>, vector<32x1xi32>
    %c15_i32 = arith.constant 15 : i32
    %95 = vector.broadcast %c15_i32 : i32 to vector<32x1xi32>
    %96 = arith.cmpi eq, %94, %95 : vector<32x1xi32>
    %97 = vector.extract_strided_slice %52 {offsets = [1, 0], sizes = [31, 128], strides = [1, 1]} : vector<32x128xf32> to vector<31x128xf32>
    %98 = tpu.concatenate %97, %53 in 0 : vector<31x128xf32>, vector<1x128xf32> -> vector<32x128xf32>
    %cst_39 = arith.constant 0.000000e+00 : f32
    %99 = vector.shape_cast %96 : vector<32x1xi1> to vector<32x1xi1>
    %100 = vector.broadcast %99 : vector<32x1xi1> to vector<32x128xi1>
    %101 = vector.broadcast %cst_39 : f32 to vector<32x128xf32>
    %102 = arith.select %100, %101, %98 : vector<32x128xi1>, vector<32x128xf32>
    %103 = arith.addf %78, %50 : vector<32x128xf32>
    %104 = arith.addf %103, %102 : vector<32x128xf32>
    %c0_40 = arith.constant 0 : index
    %c0_41 = arith.constant 0 : index
    %105 = vector.load %arg9[%c0_40, %c0_41] : memref<1x128xf32, #tpu.memory_space<vmem>>, vector<1x128xf32>
    %106 = vector.broadcast %105 : vector<1x128xf32> to vector<32x128xf32>
    %107 = arith.addf %104, %106 : vector<32x128xf32>
    %cst_42 = arith.constant 0.000000e+00 : f32
    %108 = vector.broadcast %cst_42 : f32 to vector<32x128xf32>
    %109 = arith.cmpf oge, %107, %108 : vector<32x128xf32>
    %cst_43 = arith.constant 0.00999999977 : f32
    %110 = vector.broadcast %cst_43 : f32 to vector<32x128xf32>
    %111 = arith.mulf %110, %107 : vector<32x128xf32>
    %112 = arith.select %109, %107, %111 : vector<32x128xi1>, vector<32x128xf32>
    %113 = vector.extract_strided_slice %112 {offsets = [0, 0], sizes = [16, 128], strides = [1, 1]} : vector<32x128xf32> to vector<16x128xf32>
    %cst_44 = arith.constant dense<0.000000e+00> : vector<128xf32>
    %114 = vector.multi_reduction <add>, %113, %cst_44 [0] : vector<16x128xf32> to vector<128xf32>
    %115 = vector.shape_cast %114 : vector<128xf32> to vector<1x128xf32>
    %116 = vector.extract_strided_slice %112 {offsets = [16, 0], sizes = [16, 128], strides = [1, 1]} : vector<32x128xf32> to vector<16x128xf32>
    %cst_45 = arith.constant dense<0.000000e+00> : vector<128xf32>
    %117 = vector.multi_reduction <add>, %116, %cst_45 [0] : vector<16x128xf32> to vector<128xf32>
    %118 = vector.shape_cast %117 : vector<128xf32> to vector<1x128xf32>
    %119 = tpu.concatenate %115, %118 in 0 : vector<1x128xf32>, vector<1x128xf32> -> vector<2x128xf32>
    %cst_46 = arith.constant 6.250000e-02 : f32
    %120 = vector.broadcast %cst_46 : f32 to vector<2x128xf32>
    %121 = arith.mulf %119, %120 : vector<2x128xf32>
    %122 = arith.truncf %121 : vector<2x128xf32> to vector<2x128xbf16>
    %c0_47 = arith.constant 0 : index
    %c0_48 = arith.constant 0 : index
    %123 = vector.load %arg10[%c0_47, %c0_48] : memref<128x32xbf16, #tpu.memory_space<vmem>>, vector<128x32xbf16>
    %cst_49 = arith.constant dense<0.000000e+00> : vector<2x32xf32>
    %124 = tpu.matmul %122, %123, %cst_49 {dimension_numbers = #tpu.dot_dimension_numbers<[1], [0], [0], [1], [0, 0, 1, 1], [], []>} : vector<2x128xbf16>, vector<128x32xbf16>, vector<2x32xf32> -> vector<2x32xf32>
    %c0_50 = arith.constant 0 : index
    %c0_51 = arith.constant 0 : index
    %125 = vector.load %arg11[%c0_50, %c0_51] : memref<1x32xf32, #tpu.memory_space<vmem>>, vector<1x32xf32>
    %126 = vector.broadcast %125 : vector<1x32xf32> to vector<2x32xf32>
    %127 = arith.addf %124, %126 : vector<2x32xf32>
    %cst_52 = arith.constant 0.000000e+00 : f32
    %128 = vector.broadcast %cst_52 : f32 to vector<2x32xf32>
    %129 = arith.cmpf oge, %127, %128 : vector<2x32xf32>
    %cst_53 = arith.constant 0.00999999977 : f32
    %130 = vector.broadcast %cst_53 : f32 to vector<2x32xf32>
    %131 = arith.mulf %130, %127 : vector<2x32xf32>
    %132 = arith.select %129, %127, %131 : vector<2x32xi1>, vector<2x32xf32>
    %133 = arith.truncf %132 : vector<2x32xf32> to vector<2x32xbf16>
    %c0_54 = arith.constant 0 : index
    %c0_55 = arith.constant 0 : index
    %134 = vector.load %arg12[%c0_54, %c0_55] : memref<32x64xbf16, #tpu.memory_space<vmem>>, vector<32x64xbf16>
    %cst_56 = arith.constant dense<0.000000e+00> : vector<2x64xf32>
    %135 = tpu.matmul %133, %134, %cst_56 {dimension_numbers = #tpu.dot_dimension_numbers<[1], [0], [0], [1], [0, 0, 1, 1], [], []>} : vector<2x32xbf16>, vector<32x64xbf16>, vector<2x64xf32> -> vector<2x64xf32>
    %c0_57 = arith.constant 0 : index
    %c0_58 = arith.constant 0 : index
    %136 = vector.load %arg13[%c0_57, %c0_58] : memref<1x64xf32, #tpu.memory_space<vmem>>, vector<1x64xf32>
    %137 = vector.broadcast %136 : vector<1x64xf32> to vector<2x64xf32>
    %138 = arith.addf %135, %137 : vector<2x64xf32>
    %c0_59 = arith.constant 0 : index
    %c0_60 = arith.constant 0 : index
    %139 = vector.load %arg14[%c0_59, %c0_60] : memref<2x64xf32, #tpu.memory_space<vmem>>, vector<2x64xf32>
    tpu.vector_store %arg14[%c0_59, %c0_60], %138 {strides = array<i32>} : memref<2x64xf32, #tpu.memory_space<vmem>>, vector<2x64xf32>,
    return
  }
  func.func @transform_0(%arg0: i32) -> (i32, i32) {
    %c0_i32 = arith.constant 0 : i32
    %c0_i32_0 = arith.constant 0 : i32
    %c0_i32_1 = arith.constant 0 : i32
    return %c0_i32, %c0_i32_0 : i32, i32
  }
  func.func @transform_1(%arg0: i32) -> (i32, i32) {
    %c0_i32 = arith.constant 0 : i32
    %c0_i32_0 = arith.constant 0 : i32
    %c0_i32_1 = arith.constant 0 : i32
    return %c0_i32, %c0_i32_0 : i32, i32
  }
  func.func @transform_2(%arg0: i32) -> (i32, i32) {
    %c0_i32 = arith.constant 0 : i32
    %c0_i32_0 = arith.constant 0 : i32
    %c0_i32_1 = arith.constant 0 : i32
    return %c0_i32, %c0_i32_0 : i32, i32
  }
  func.func @transform_3(%arg0: i32) -> (i32, i32) {
    %c0_i32 = arith.constant 0 : i32
    %c0_i32_0 = arith.constant 0 : i32
    %c0_i32_1 = arith.constant 0 : i32
    return %c0_i32, %c0_i32_0 : i32, i32
  }
  func.func @transform_4(%arg0: i32) -> (i32, i32) {
    %c0_i32 = arith.constant 0 : i32
    %c0_i32_0 = arith.constant 0 : i32
    %c0_i32_1 = arith.constant 0 : i32
    return %c0_i32, %c0_i32_0 : i32, i32
  }
  func.func @transform_5(%arg0: i32) -> (i32, i32) {
    %c0_i32 = arith.constant 0 : i32
    %c0_i32_0 = arith.constant 0 : i32
    %c0_i32_1 = arith.constant 0 : i32
    return %c0_i32, %c0_i32_0 : i32, i32
  }
  func.func @transform_6(%arg0: i32) -> (i32, i32) {
    %c0_i32 = arith.constant 0 : i32
    %c0_i32_0 = arith.constant 0 : i32
    %c0_i32_1 = arith.constant 0 : i32
    return %c0_i32, %c0_i32_0 : i32, i32
  }
  func.func @transform_7(%arg0: i32) -> (i32, i32) {
    %c0_i32 = arith.constant 0 : i32
    %c0_i32_0 = arith.constant 0 : i32
    %c0_i32_1 = arith.constant 0 : i32
    return %c0_i32, %c0_i32_0 : i32, i32
  }
  func.func @transform_8(%arg0: i32) -> (i32, i32) {
    %c0_i32 = arith.constant 0 : i32
    %c0_i32_0 = arith.constant 0 : i32
    %c0_i32_1 = arith.constant 0 : i32
    return %c0_i32, %c0_i32_0 : i32, i32
  }
  func.func @transform_9(%arg0: i32) -> (i32, i32) {
    %c0_i32 = arith.constant 0 : i32
    %c0_i32_0 = arith.constant 0 : i32
    %c0_i32_1 = arith.constant 0 : i32
    return %c0_i32, %c0_i32_0 : i32, i32
  }
  func.func @transform_10(%arg0: i32) -> (i32, i32) {
    %c0_i32 = arith.constant 0 : i32
    %c0_i32_0 = arith.constant 0 : i32
    %c0_i32_1 = arith.constant 0 : i32
    return %c0_i32, %c0_i32_0 : i32, i32
  }
  func.func @transform_11(%arg0: i32) -> (i32, i32) {
    %c0_i32 = arith.constant 0 : i32
    %c0_i32_0 = arith.constant 0 : i32
    %c0_i32_1 = arith.constant 0 : i32
    return %c0_i32, %c0_i32_0 : i32, i32
  }
  func.func @transform_12(%arg0: i32) -> (i32, i32) {
    %c0_i32 = arith.constant 0 : i32
    %c0_i32_0 = arith.constant 0 : i32
    %c0_i32_1 = arith.constant 0 : i32
    return %c0_i32, %c0_i32_0 : i32, i32
  }
  func.func @transform_13(%arg0: i32) -> (i32, i32) {
    %c0_i32 = arith.constant 0 : i32
    %c0_i32_0 = arith.constant 0 : i32
    %c0_i32_1 = arith.constant 0 : i32
    return %c0_i32, %c0_i32_0 : i32, i32
  }
}

</mosaic_0001>

<bundles_post_ra>
// kernel: eeg_to_latent_forward.1
= control target key start
LH: loop header
LB: loop body
LE: loop exit
PB: predicated region body
PF: predicated region fallthrough
CT: control target
= control target key end

     0   :  { %18 = vsyncpa [#allocation3], 0  ;;  %s4149_s0 = inlined_call_operand.vmem [shape: f32[32,8], index: 0, kind: input, shape index: {}]   ;;  %s4150_s1 = inlined_call_operand.vmem [shape: bf16[8,32], index: 1, kind: input, shape index: {}]   ;;  %s4151_s2 = inlined_call_operand.vmem [shape: f32[1,32], index: 2, kind: input, shape index: {}]   ;;  %s4152_s3 = inlined_call_operand.vmem [shape: bf16[32,256], index: 3, kind: input, shape index: {}]   ;;  %s4153_s4 = inlined_call_operand.vmem [shape: f32[1,256], index: 4, kind: input, shape index: {}]   ;;  %s4154_s5 = inlined_call_operand.hbm [shape: bf16[256,128], index: 5, kind: input, shape index: {}]   ;;  %s4155_s6 = inlined_call_operand.hbm [shape: bf16[256,128], index: 6, kind: input, shape index: {}]   ;;  %s4156_s7 = inlined_call_operand.hbm [shape: bf16[256,128], index: 7, kind: input, shape index: {}]   ;;  %s4157_s8 = inlined_call_operand.vmem [shape: f32[1,128], index: 8, kind: input, shape index: {}]   ;;  %s4158_s9 = inlined_call_operand.vmem [shape: bf16[128,32], index: 9, kind: input, shape index: {}]   ;;  %s4159_s10 = inlined_call_operand.vmem [shape: f32[1,32], index: 10, kind: input, shape index: {}]   ;;  %s4160_s11 = inlined_call_operand.vmem [shape: bf16[32,64], index: 11, kind: input, shape index: {}]   ;;  %s4161_s12 = inlined_call_operand.vmem [shape: f32[1,64], index: 12, kind: input, shape index: {}]   ;;  %s4162_s13 = inlined_call_operand.hbm [shape: f32[2,64], index: 13, kind: output, shape index: {}]  }
   0x1   :  { %19 = vsyncpa [#allocation6], 0 }
   0x2   :  { %20 = vsyncpa [#allocation4], 0  ;;  %s48_s27 = sshll.u32 %s4155_s6, 4  ;;  %s3126_s28 = smov [#allocation5]   ;;  %s49_s27 = int_to_ptr.hbm [resolvable:$true] %s48_s27 }
   0x3   :  { %s50_s29 = sshll.u32 %s3126_s28, 4  ;;  %s35_s15 = sshll.u32 %s4154_s5, 4  ;;  %s51_s29 = int_to_ptr.vmem [resolvable:$true] %s50_s29  ;;  %s36_s15 = int_to_ptr.hbm [resolvable:$true] %s35_s15 }
   0x4   :  { %s3127_s16 = smov 64   ;;  %s3128_s17 = smov 4  }
   0x5   :  { %56 = dma.hbm_to_vmem [thread:$0]  %s49_s27, 2048, %s51_s29, [#allocation6], %s3127_s16, %s3127_s16, %s3128_s17  }
   0x6   :  { %s3129_s18 = smov [#allocation2]   ;;  %s61_s22 = sshll.u32 %s4156_s7, 4  ;;  %s62_s22 = int_to_ptr.hbm [resolvable:$true] %s61_s22 }
   0x7   :  { %s37_s19 = sshll.u32 %s3129_s18, 4  ;;  %s3130_s6 = smov [#allocation7]   ;;  %s38_s19 = int_to_ptr.vmem [resolvable:$true] %s37_s19 }
   0x8   :  { %43 = dma.hbm_to_vmem [thread:$0]  %s36_s15, 2048, %s38_s19, [#allocation3], %s3127_s16, %s3127_s16, %s3128_s17  }
   0x9   :  { %s63_s23 = sshll.u32 %s3130_s6, 4  ;;  %s64_s23 = int_to_ptr.vmem [resolvable:$true] %s63_s23 }
   0xa   :  { %69 = dma.hbm_to_vmem [thread:$0]  %s62_s22, 2048, %s64_s23, [#allocation6], %s3127_s16, %s3127_s16, %s3128_s17  }
   0xb   :  { %3120 = dma.done.wait [#allocation3], 2048  }
   0xc   :  { %3121 = vsyncadd [#allocation3], 4294965248 }
   0xd   :  { %3122 = dma.done.wait [#allocation6], 4096  }
   0xe   :  { %3123 = vsyncadd [#allocation6], 4294963200  ;;  %v163_v0 = vlaneseq  ;;  %vm107_vm0 = vcmask 1043456   ;;  %v99_v2 = vld [vmem:[%s4150_s1] sm:$0xf]  ;;  %v94_v3 = vld [vmem:[%s4149_s0 + $0x8] sm:$0xff] }
   0xf   :  { %v93_v4 = vld [vmem:[%s4149_s0] sm:$0xff]  ;;  %v109_v5 = vsel %vm107_vm0, %v99_v2, 0  ;;  %v218_v6 = vperm.slane %v94_v3, 0  ;;  %vm100_vm1 = vcmask 64512   ;;  %v225_v10 = vperm.slane %v94_v3, 1  ;;  %v95_v13 = vld [vmem:[%s4149_s0 + $0x10] sm:$0xff] }
  0x10   :  { %v3211_v1 = vshrl.u32 %v163_v0, 7  ;;  %v176_v7 = vperm.slane %v93_v4, 2  ;;  %118 = vmatpush.bf16.msra.mxu0 %v109_v5  ;;  %v162_v8 = vperm.slane %v93_v4, 0  ;;  %v97_v9 = vpack.c.bf16 %v94_v3, %v93_v4  ;;  %v96_v14 = vld [vmem:[%s4149_s0 + $0x18] sm:$0xff]  ;;  %v3244_v46 = vld [vmem:[%s4151_s2] ss:$0 sm:$0xff] }
  0x11   :  { %v232_v11 = vperm.slane %v94_v3, 2  ;;  %v169_v12 = vperm.slane %v93_v4, 1  ;;  %v239_v15 = vperm.slane %v94_v3, 3  ;;  %v190_v16 = vperm.slane %v93_v4, 4  ;;  %s2530_s30 = sshll.u32 %s4162_s13, 4  ;;  %s2531_s30 = int_to_ptr.hbm [resolvable:$true] %s2530_s30 }
  0x12   :  { %4199 = vst [vmem:[#allocation12_spill] sm:$0xff] %v3211_v1  ;;  %2874 = vset.pattern.permute.xlu2 %v3211_v1  ;;  %2873 = vset.pattern.permute.xlu1 %v3211_v1  ;;  %v183_v17 = vperm.slane %v93_v4, 3  ;;  %v98_v18 = vpack.c.bf16 %v96_v14, %v95_v13  ;;  %v197_v19 = vperm.slane %v93_v4, 5  ;;  %v253_v20 = vperm.slane %v94_v3, 5 }
  0x13   :  { %2872 = vset.pattern.permute.xlu0 %v3211_v1  ;;  %2541 = vmatmul.msk.bf16.vlgmr.msra.gmra.mxu0 %vm100_vm1, %v97_v9  ;;  %v246_v21 = vperm.slane %v94_v3, 4  ;;  %v260_v22 = vperm.slane %v94_v3, 6  ;;  %v211_v23 = vperm.slane %v93_v4, 7  ;;  %v204_v24 = vperm.slane %v93_v4, 6 }
  0x14   :  { %v274_v25 = vperm.slane %v95_v13, 0  ;;  %v281_v26 = vperm.slane %v95_v13, 1  ;;  %v267_v27 = vperm.slane %v94_v3, 7  ;;  %v337_v28 = vperm.slane %v96_v14, 1 }
  0x15   :  { %v288_v29 = vperm.slane %v95_v13, 2  ;;  %v330_v30 = vperm.slane %v96_v14, 0  ;;  %v295_v31 = vperm.slane %v95_v13, 3  ;;  %v351_v32 = vperm.slane %v96_v14, 3 }
  0x16   :  { %v344_v33 = vperm.slane %v96_v14, 2  ;;  %v358_v34 = vperm.slane %v96_v14, 4  ;;  %v309_v35 = vperm.slane %v95_v13, 5  ;;  %v302_v36 = vperm.slane %v95_v13, 4 }
  0x17   :  { %v316_v37 = vperm.slane %v95_v13, 6  ;;  %v372_v38 = vperm.slane %v96_v14, 6  ;;  %v365_v39 = vperm.slane %v96_v14, 5  ;;  %v379_v40 = vperm.slane %v96_v14, 7 }
  0x18   :  { %v323_v41 = vperm.slane %v95_v13, 7  ;;  %vm614_vm3 = vcmask 261120  }
  0x1a   :  { %223 = vperm.xlu1 %2873, %v218_v6   ;;  %181 = vperm.xlu2 %2874, %v176_v7  }
  0x1b   :  { %167 = vperm.xlu0 %2872, %v162_v8  }
  0x22   :  { %230 = vperm.xlu1 %2873, %v225_v10   ;;  %237 = vperm.xlu2 %2874, %v232_v11  }
  0x23   :  { %174 = vperm.xlu0 %2872, %v169_v12   ;;  %2542 = vmatmul.msk.bf16.gmra.mxu0 %vm100_vm1, %v98_v18 }
  0x2a   :  { %244 = vperm.xlu1 %2873, %v239_v15   ;;  %195 = vperm.xlu2 %2874, %v190_v16  }
  0x2b   :  { %188 = vperm.xlu0 %2872, %v183_v17  }
  0x32   :  { %202 = vperm.xlu1 %2873, %v197_v19   ;;  %258 = vperm.xlu2 %2874, %v253_v20  }
  0x33   :  { %251 = vperm.xlu0 %2872, %v246_v21  }
  0x3a   :  { %265 = vperm.xlu1 %2873, %v260_v22   ;;  %216 = vperm.xlu2 %2874, %v211_v23  }
  0x3b   :  { %209 = vperm.xlu0 %2872, %v204_v24  }
  0x42   :  { %279 = vperm.xlu1 %2873, %v274_v25   ;;  %286 = vperm.xlu2 %2874, %v281_v26  }
  0x43   :  { %272 = vperm.xlu0 %2872, %v267_v27  }
  0x4a   :  { %342 = vperm.xlu1 %2873, %v337_v28   ;;  %293 = vperm.xlu2 %2874, %v288_v29  }
  0x4b   :  { %335 = vperm.xlu0 %2872, %v330_v30  }
  0x52   :  { %300 = vperm.xlu1 %2873, %v295_v31   ;;  %356 = vperm.xlu2 %2874, %v351_v32  }
  0x53   :  { %349 = vperm.xlu0 %2872, %v344_v33  }
  0x5a   :  { %363 = vperm.xlu1 %2873, %v358_v34   ;;  %314 = vperm.xlu2 %2874, %v309_v35  }
  0x5b   :  { %307 = vperm.xlu0 %2872, %v302_v36  }
  0x62   :  { %321 = vperm.xlu1 %2873, %v316_v37   ;;  %377 = vperm.xlu2 %2874, %v372_v38  }
  0x63   :  { %370 = vperm.xlu0 %2872, %v365_v39  }
  0x6a   :  { %384 = vperm.xlu1 %2873, %v379_v40  }
  0x6b   :  { %328 = vperm.xlu0 %2872, %v323_v41  }
  0x74   :  { %v3233_v42 = vpop.permute.xlu2 %181 }
  0x75   :  { %4200 = vst [vmem:[#allocation13_spill] sm:$0xff] %v3233_v42  ;;  %v392_v62 = vmul.f32 %v3244_v46, %v3233_v42 }
  0x7c   :  { %v3237_v44 = vpop.permute.xlu2 %237 }
  0x7d   :  { %4202 = vst [vmem:[#allocation15_spill] sm:$0xff] %v3237_v44 }
  0x84   :  { %v3254_v53 = vpop.permute.xlu2 %195 }
  0x85   :  { %4204 = vst [vmem:[#allocation17_spill] sm:$0xff] %v3254_v53  ;;  %v394_v63 = vmul.f32 %v3244_v46, %v3254_v53 }
  0x8c   :  { %v3269_v7 = vpop.permute.xlu1 %223  ;;  %v3271_v10 = vpop.permute.xlu2 %258 }
  0x8d   :  { %v3235_v43 = vpop.permute.xlu0 %167  ;;  %4205 = vst [vmem:[#allocation18_spill] sm:$0xff] %v3269_v7 }
  0x8e   :  { %4201 = vst [vmem:[#allocation14_spill] sm:$0xff] %v3235_v43  ;;  %v390_v49 = vmul.f32 %v3244_v46, %v3235_v43 }
  0x8f   :  { %4206 = vst [vmem:[#allocation19_spill] sm:$0xff] %v3271_v10 }
  0x90   :  { %v3246_v47 = vpop.f32.mrf.mxu0 }
  0x91   :  { %v134_v48 = vrot.slane %v3246_v47, 1  ;;  %v135_v50 = vrot.slane %v3246_v47, 2  ;;  %v137_v51 = vrot.slane %v3246_v47, 4  ;;  %v422_v52 = vperm.slane %v3246_v47, 0 }
  0x92   :  { %v136_v56 = vrot.slane %v3246_v47, 3  ;;  %v140_v22 = vrot.slane %v3246_v47, 7 }
  0x93   :  { %v486_v54 = vadd.f32 %v422_v52, %v390_v49  ;;  %v423_v55 = vperm.slane %v134_v48, 0  ;;  %v424_v57 = vperm.slane %v135_v50, 0  ;;  %v426_v58 = vperm.slane %v137_v51, 0 }
  0x94   :  { %v425_v3 = vperm.slane %v136_v56, 0  ;;  %v3292_v26 = vpop.permute.xlu1 %230  ;;  %v3294_v29 = vpop.permute.xlu2 %216  ;;  %v429_v32 = vperm.slane %v140_v22, 0  ;;  %v138_v22 = vrot.slane %v3246_v47, 5 }
  0x95   :  { %v3239_v45 = vpop.permute.xlu0 %174  ;;  %v550_v61 = vmul.f32 0.2, %v486_v54  ;;  %vm518_vm2 = vcmp.ge.f32.partialorder %v486_v54, 0.0  ;;  %v488_v4 = vadd.f32 %v424_v57, %v392_v62  ;;  %v490_v5 = vadd.f32 %v426_v58, %v394_v63  ;;  %4207 = vst [vmem:[#allocation20_spill] sm:$0xff] %v3292_v26 }
  0x96   :  { %4203 = vst [vmem:[#allocation16_spill] sm:$0xff] %v3239_v45  ;;  %v391_v60 = vmul.f32 %v3244_v46, %v3239_v45  ;;  %v397_v34 = vmul.f32 %v3244_v46, %v3294_v29 }
  0x97   :  { %v3267_v6 = vsel %vm518_vm2, %v486_v54, %v550_v61  ;;  %v552_v11 = vmul.f32 0.2, %v488_v4  ;;  %v554_v12 = vmul.f32 0.2, %v490_v5  ;;  %vm520_vm5 = vcmp.ge.f32.partialorder %v488_v4, 0.0  ;;  %4208 = vst [vmem:[#allocation21_spill] sm:$0xff] %v3294_v29 }
  0x98   :  { %v487_v0 = vadd.f32 %v423_v55, %v391_v60  ;;  %v615_v13 = vsel %vm614_vm3, %v3267_v6, -inf  ;;  %vm522_vm6 = vcmp.ge.f32.partialorder %v490_v5, 0.0  ;;  %v493_v39 = vadd.f32 %v429_v32, %v397_v34  ;;  %v3300_v55 = vpop.f32.mrf.mxu0 }
  0x99   :  { %v616_v16 = vrot.slane %v615_v13, 4  ;;  %v3279_v18 = vsel %vm520_vm5, %v488_v4, %v552_v11  ;;  %v3281_v19 = vsel %vm522_vm6, %v490_v5, %v554_v12  ;;  %v141_v63 = vrot.slane %v3300_v55, 1 }
  0x9a   :  { %v551_v8 = vmul.f32 0.2, %v487_v0  ;;  %vm519_vm4 = vcmp.ge.f32.partialorder %v487_v0, 0.0  ;;  %v629_v24 = vsel %vm614_vm3, %v3279_v18, -inf  ;;  %v643_v25 = vsel %vm614_vm3, %v3281_v19, -inf }
  0x9b   :  { %v617_v23 = vmax.f32 %v615_v13, %v616_v16  ;;  %v630_v30 = vrot.slane %v629_v24, 4  ;;  %v644_v31 = vrot.slane %v643_v25, 4  ;;  %v557_v51 = vmul.f32 0.2, %v493_v39 }
  0x9c   :  { %v3275_v15 = vsel %vm519_vm4, %v487_v0, %v551_v8  ;;  %v3298_v54 = vpop.permute.xlu1 %244  ;;  %vm525_vm8 = vcmp.ge.f32.partialorder %v493_v39, 0.0  ;;  %v142_v0 = vrot.slane %v3300_v55, 2  ;;  %v143_v4 = vrot.slane %v3300_v55, 3 }
  0x9d   :  { %v3257_v59 = vpop.permute.xlu0 %188  ;;  %v622_v20 = vsel %vm614_vm3, %v3275_v15, -inf  ;;  %v618_v33 = vrot.slane %v617_v23, 2  ;;  %v631_v37 = vmax.f32 %v629_v24, %v630_v30  ;;  %v645_v38 = vmax.f32 %v643_v25, %v644_v31  ;;  %4209 = vst [vmem:[#allocation22_spill] sm:$0xff] %v3298_v54 }
  0x9e   :  { %v393_v2 = vmul.f32 %v3244_v46, %v3257_v59  ;;  %v623_v27 = vrot.slane %v622_v20, 4  ;;  %v3302_v61 = vsel %vm525_vm8, %v493_v39, %v557_v51  ;;  %v145_v11 = vrot.slane %v3300_v55, 5 }
  0x9f   :  { %v619_v40 = vmax.f32 %v617_v23, %v618_v33  ;;  %v632_v49 = vrot.slane %v631_v37, 2  ;;  %v646_v50 = vrot.slane %v645_v38, 2  ;;  %v430_v13 = vperm.slane %v3300_v55, 0 }
  0xa0   :  { %v489_v9 = vadd.f32 %v425_v3, %v393_v2  ;;  %v624_v35 = vmax.f32 %v622_v20, %v623_v27  ;;  %v398_v16 = vmul.f32 %v3244_v46, %v3269_v7  ;;  %v399_v20 = vmul.f32 %v3244_v46, %v3292_v26 }
  0xa1   :  { %v620_v52 = vrot.slane %v619_v40, 1  ;;  %v633_v58 = vmax.f32 %v631_v37, %v632_v49  ;;  %v647_v60 = vmax.f32 %v645_v38, %v646_v50  ;;  %v433_v27 = vperm.slane %v143_v4, 0 }
  0xa2   :  { %vm521_vm7 = vcmp.ge.f32.partialorder %v489_v9, 0.0  ;;  %v553_v14 = vmul.f32 0.2, %v489_v9  ;;  %v625_v41 = vrot.slane %v624_v35, 2  ;;  %v435_v32 = vperm.slane %v145_v11, 0 }
  0xa3   :  { %v621_v62 = vmax.f32 %v619_v40, %v620_v52  ;;  %v634_v5 = vrot.slane %v633_v58, 1  ;;  %v648_v8 = vrot.slane %v647_v60, 1  ;;  %v401_v34 = vmul.f32 %v3244_v46, %v3298_v54 }
  0xa4   :  { %v3277_v17 = vsel %vm521_vm7, %v489_v9, %v553_v14  ;;  %v626_v56 = vmax.f32 %v624_v35, %v625_v41  ;;  %v664_v9 = vsel %vm614_vm3, %v3302_v61, -inf  ;;  %v431_v14 = vperm.slane %v141_v63, 0 }
  0xa5   :  { %v636_v21 = vsel %vm614_vm3, %v3277_v17, -inf  ;;  %v839_v12 = vsub.f32 %v3267_v6, %v621_v62  ;;  %v665_v24 = vrot.slane %v664_v9, 4  ;;  %v400_v6 = vmul.f32 %v3244_v46, %v3237_v44  ;;  %v3333_v62 = vpop.permute.xlu0 %251 }
  0xa6   :  { %v637_v28 = vrot.slane %v636_v21, 4  ;;  %v627_v2 = vrot.slane %v626_v56, 1  ;;  %v635_v30 = vmax.f32 %v633_v58, %v634_v5  ;;  %v649_v31 = vmax.f32 %v647_v60, %v648_v8 }
  0xa7   :  { %v871_v33 = vmul.f32 1.442695, %v839_v12  ;;  %v494_v35 = vadd.f32 %v430_v13, %v398_v16  ;;  %v403_v37 = vmul.f32 %v3244_v46, %v3271_v10  ;;  %v427_v40 = vperm.slane %v138_v22, 0 }
  0xa8   :  { %v638_v36 = vmax.f32 %v636_v21, %v637_v28  ;;  %v432_v21 = vperm.slane %v142_v0, 0  ;;  %v628_v23 = vmax.f32 %v626_v56, %v627_v2  ;;  %v3317_v28 = vpop.permute.xlu1 %202  ;;  %v3327_v41 = vmax.f32 %v664_v9, %v665_v24 }
  0xa9   :  { %v395_v39 = vmul.f32 %v3244_v46, %v3317_v28  ;;  %v497_v50 = vadd.f32 %v433_v27, %v401_v34  ;;  %v841_v51 = vsub.f32 %v3279_v18, %v635_v30  ;;  %v843_v52 = vsub.f32 %v3281_v19, %v649_v31  ;;  %v3336_v18 = vpop.f32.mrf.mxu0 }
  0xaa   :  { %v639_v48 = vrot.slane %v638_v36, 2  ;;  %v496_v38 = vadd.f32 %v432_v21, %v400_v6  ;;  %v499_v56 = vadd.f32 %v435_v32, %v403_v37  ;;  %2879 = vpow2.f32 %v871_v33 }
  0xab   :  { %vm526_vm9 = vcmp.ge.f32.partialorder %v494_v35, 0.0  ;;  %v558_v58 = vmul.f32 0.2, %v494_v35  ;;  %v875_v19 = vmul.f32 1.442695, %v841_v51  ;;  %vm529_vm13 = vcmp.ge.f32.partialorder %v497_v50, 0.0 }
  0xac   :  { %v640_v57 = vmax.f32 %v638_v36, %v639_v48  ;;  %v495_v36 = vadd.f32 %v431_v14, %v399_v20  ;;  %v840_v48 = vsub.f32 %v3275_v15, %v628_v23  ;;  %v560_v63 = vmul.f32 0.2, %v496_v38  ;;  %v3355_v23 = vpop.permute.xlu2 %286 }
  0xad   :  { %vm528_vm12 = vcmp.ge.f32.partialorder %v496_v38, 0.0  ;;  %v402_v4 = vmul.f32 %v3244_v46, %v3333_v62  ;;  %v561_v5 = vmul.f32 0.2, %v497_v50  ;;  %v3343_v8 = vsel %vm526_vm9, %v494_v35, %v558_v58 }
  0xae   :  { %v641_v3 = vrot.slane %v640_v57, 1  ;;  %v559_v60 = vmul.f32 0.2, %v495_v36  ;;  %vm527_vm10 = vcmp.ge.f32.partialorder %v495_v36, 0.0  ;;  %v873_v15 = vmul.f32 1.442695, %v840_v48 }
  0xaf   :  { %v3350_v13 = vsel %vm528_vm12, %v496_v38, %v560_v63  ;;  %v148_v16 = vrot.slane %v3336_v18, 1  ;;  %v879_v21 = vmul.f32 1.442695, %v843_v52  ;;  %vm531_vm14 = vcmp.ge.f32.partialorder %v499_v56, 0.0 }
  0xb0   :  { %v642_v25 = vmax.f32 %v640_v57, %v641_v3  ;;  %v491_v57 = vadd.f32 %v427_v40, %v395_v39  ;;  %v3348_v12 = vsel %vm527_vm10, %v495_v36, %v559_v60  ;;  %v3353_v20 = vpop.eup %2879  ;;  %v563_v24 = vmul.f32 0.2, %v499_v56 }
  0xb1   :  { %4210 = vst [vmem:[#allocation23_spill] sm:$0xff] %v3353_v20  ;;  %v3360_v6 = vsel %vm529_vm13, %v497_v50, %v561_v5  ;;  %v678_v30 = vsel %vm614_vm3, %v3348_v12, -inf  ;;  %v685_v31 = vsel %vm614_vm3, %v3350_v13, -inf  ;;  %v935_v32 = vsel %vm614_vm3, %v3353_v20, 0.0 }
  0xb2   :  { %v842_v49 = vsub.f32 %v3277_v17, %v642_v25  ;;  %vm523_vm11 = vcmp.ge.f32.partialorder %v491_v57, 0.0  ;;  %v555_v0 = vmul.f32 0.2, %v491_v57  ;;  %v144_v17 = vrot.slane %v3300_v55, 4 }
  0xb3   :  { %v671_v25 = vsel %vm614_vm3, %v3343_v8, -inf  ;;  %v439_v34 = vperm.slane %v148_v16, 0  ;;  %v667_v35 = vrot.slane %v3327_v41, 2  ;;  %v407_v36 = vmul.f32 %v3244_v46, %v3355_v23 }
  0xb4   :  { %v877_v2 = vmul.f32 1.442695, %v842_v49  ;;  %v3338_v3 = vsel %vm523_vm11, %v491_v57, %v555_v0  ;;  %v434_v11 = vperm.slane %v144_v17, 0  ;;  %v672_v37 = vrot.slane %v671_v25, 4 }
  0xb5   :  { %v650_v9 = vsel %vm614_vm3, %v3338_v3, -inf  ;;  %v3372_v39 = vsel %vm531_vm14, %v499_v56, %v563_v24  ;;  %v3376_v40 = vsel %vm614_vm3, %v3360_v6, -inf  ;;  %v936_v50 = vrot.slane %v935_v32, 4 }
  0xb6   :  { %v651_v14 = vrot.slane %v650_v9, 4  ;;  %2881 = vpow2.f32 %v877_v2  ;;  %v498_v22 = vadd.f32 %v434_v11, %v402_v4  ;;  %v679_v51 = vrot.slane %v678_v30, 4  ;;  %v3392_v4 = vpop.permute.xlu1 %265 }
  0xb7   :  { %2883 = vpow2.f32 %v873_v15  ;;  %v686_v52 = vrot.slane %v685_v31, 4  ;;  %v503_v56 = vadd.f32 %v439_v34, %v407_v36  ;;  %v3389_v15 = vmax.f32 %v3327_v41, %v667_v35 }
  0xb8   :  { %v652_v27 = vmax.f32 %v650_v9, %v651_v14  ;;  %2885 = vpow2.f32 %v875_v19  ;;  %vm530_vm15 = vcmp.ge.f32.partialorder %v498_v22, 0.0  ;;  %v562_v38 = vmul.f32 0.2, %v498_v22 }
  0xb9   :  { %2887 = vpow2.f32 %v879_v21  ;;  %v673_v2 = vmax.f32 %v671_v25, %v672_v37  ;;  %v693_v17 = vrot.slane %v3376_v40, 4  ;;  %v706_v9 = vsel %vm614_vm3, %v3372_v39, -inf }
  0xba   :  { %v653_v33 = vrot.slane %v652_v27, 2  ;;  %v3380_v57 = vsel %vm530_vm15, %v498_v22, %v562_v38  ;;  %v146_v14 = vrot.slane %v3300_v55, 6  ;;  %v3399_v16 = vadd.f32 %v936_v50, %v935_v32 }
  0xbb   :  { %v699_v63 = vsel %vm614_vm3, %v3380_v57, -inf  ;;  %v680_v21 = vmax.f32 %v678_v30, %v679_v51  ;;  %v687_v22 = vmax.f32 %v685_v31, %v686_v52  ;;  %vm535_vm0 = vcmp.ge.f32.partialorder %v503_v56, 0.0  ;;  %v3420_v52 = vpop.permute.xlu0 %209 }
  0xbc   :  { %v654_v48 = vmax.f32 %v652_v27, %v653_v33  ;;  %v3378_v49 = vpop.eup %2881  ;;  %v700_v19 = vrot.slane %v699_v63, 4  ;;  %v404_v33 = vmul.f32 %v3244_v46, %v3392_v4  ;;  %v149_v35 = vrot.slane %v3336_v18, 2 }
  0xbd   :  { %v3382_v58 = vpop.eup %2883  ;;  %v956_v5 = vsel %vm614_vm3, %v3378_v49, 0.0  ;;  %v567_v36 = vmul.f32 0.2, %v503_v56  ;;  %v674_v30 = vrot.slane %v673_v2, 2  ;;  %v436_v38 = vperm.slane %v146_v14, 0 }
  0xbe   :  { %4211 = vst [vmem:[#allocation24_spill] sm:$0xff] %v3382_v58  ;;  %v655_v60 = vrot.slane %v654_v48, 1  ;;  %v3386_v0 = vpop.eup %2885  ;;  %v942_v41 = vsel %vm614_vm3, %v3382_v58, 0.0  ;;  %v957_v34 = vrot.slane %v956_v5, 4  ;;  %v701_v32 = vmax.f32 %v699_v63, %v700_v19  ;;  %v3422_v63 = vpop.permute.xlu2 %293 }
  0xbf   :  { %4212 = vst [vmem:[#allocation25_spill] sm:$0xff] %v3386_v0  ;;  %v3403_v24 = vpop.eup %2887  ;;  %v3407_v25 = vsel %vm614_vm3, %v3386_v0, 0.0  ;;  %v943_v37 = vrot.slane %v942_v41, 4  ;;  %v3418_v51 = vsel %vm535_vm0, %v503_v56, %v567_v36  ;;  %v139_v54 = vrot.slane %v3246_v47, 6 }
  0xc0   :  { %v656_v11 = vmax.f32 %v654_v48, %v655_v60  ;;  %4213 = vst [vmem:[#allocation26_spill] sm:$0xff] %v3403_v24  ;;  %v3416_v50 = vsel %vm614_vm3, %v3403_v24, 0.0  ;;  %v681_v60 = vrot.slane %v680_v21, 2  ;;  %v734_v19 = vsel %vm614_vm3, %v3418_v51, -inf }
  0xc1   :  { %4214 = vst [vmem:[#allocation27_spill] sm:$0xff] %v3422_v63  ;;  %v958_v14 = vadd.f32 %v957_v34, %v956_v5  ;;  %v440_v48 = vperm.slane %v149_v35, 0  ;;  %v735_v1 = vrot.slane %v734_v19, 4  ;;  %v396_v56 = vmul.f32 %v3244_v46, %v3420_v52 }
  0xc2   :  { %v844_v27 = vsub.f32 %v3338_v3, %v656_v11  ;;  %v702_v3 = vrot.slane %v701_v32, 2  ;;  %v500_v11 = vadd.f32 %v436_v38, %v404_v33  ;;  %v938_v36 = vrot.slane %v3399_v16, 2 }
  0xc3   :  { %v707_v44 = vrot.slane %v706_v9, 4  ;;  %v408_v26 = vmul.f32 %v3244_v46, %v3422_v63  ;;  %v736_v33 = vmax.f32 %v734_v19, %v735_v1  ;;  %v428_v34 = vperm.slane %v139_v54, 0 }
  0xc4   :  { %v881_v31 = vmul.f32 1.442695, %v844_v27  ;;  %v703_v27 = vmax.f32 %v701_v32, %v702_v3  ;;  %vm532_vm1 = vcmp.ge.f32.partialorder %v500_v11, 0.0  ;;  %v564_v10 = vmul.f32 0.2, %v500_v11 }
  0xc5   :  { %v3434_v32 = vadd.f32 %v943_v37, %v942_v41  ;;  %v682_v35 = vmax.f32 %v680_v21, %v681_v60  ;;  %v688_v38 = vrot.slane %v687_v22, 2  ;;  %v504_v47 = vadd.f32 %v440_v48, %v408_v26 }
  0xc6   :  { %2889 = vpow2.f32 %v881_v31  ;;  %v675_v31 = vmax.f32 %v673_v2, %v674_v30  ;;  %v704_v29 = vrot.slane %v703_v27, 1  ;;  %v3432_v5 = vsel %vm532_vm1, %v500_v11, %v564_v10 }
  0xc7   :  { %v959_v53 = vrot.slane %v958_v14, 2  ;;  %v713_v2 = vsel %vm614_vm3, %v3432_v5, -inf  ;;  %v492_v30 = vadd.f32 %v428_v34, %v396_v56  ;;  %v694_v1 = vmax.f32 %v3376_v40, %v693_v17  ;;  %v3444_v56 = vpop.f32.mrf.mxu0 }
  0xc8   :  { %v676_v63 = vrot.slane %v675_v31, 1  ;;  %v708_v10 = vmax.f32 %v706_v9, %v707_v44  ;;  %v705_v41 = vmax.f32 %v703_v27, %v704_v29  ;;  %v737_v21 = vrot.slane %v736_v33, 2  ;;  %v3448_v9 = vpop.permute.xlu1 %279 }
  0xc9   :  { %v714_v37 = vrot.slane %v713_v2, 4  ;;  %vm524_vm2 = vcmp.ge.f32.partialorder %v492_v30, 0.0  ;;  %v683_v26 = vrot.slane %v682_v35, 1  ;;  %v689_v48 = vmax.f32 %v687_v22, %v688_v38 }
  0xca   :  { %v568_v60 = vmul.f32 0.2, %v504_v47  ;;  %v556_v19 = vmul.f32 0.2, %v492_v30  ;;  %v960_v11 = vadd.f32 %v959_v53, %v958_v14  ;;  %vm536_vm4 = vcmp.ge.f32.partialorder %v504_v47, 0.0 }
  0xcb   :  { %v715_v42 = vmax.f32 %v713_v2, %v714_v37  ;;  %v677_v34 = vmax.f32 %v675_v31, %v676_v63  ;;  %v695_v40 = vrot.slane %v694_v1, 2  ;;  %v709_v44 = vrot.slane %v708_v10, 2 }
  0xcc   :  { %v3436_v3 = vpop.eup %2889  ;;  %v3446_v17 = vsel %vm524_vm2, %v492_v30, %v556_v19  ;;  %v851_v29 = vsub.f32 %v3380_v57, %v705_v41  ;;  %v738_v27 = vmax.f32 %v736_v33, %v737_v21  ;;  %v690_v53 = vrot.slane %v689_v48, 1 }
  0xcd   :  { %v970_v54 = vsel %vm614_vm3, %v3436_v3, 0.0  ;;  %v716_v24 = vrot.slane %v715_v42, 2  ;;  %v657_v22 = vsel %vm614_vm3, %v3446_v17, -inf  ;;  %v3453_v14 = vsel %vm536_vm4, %v504_v47, %v568_v60 }
  0xce   :  { %v971_v7 = vrot.slane %v970_v54, 4  ;;  %v658_v38 = vrot.slane %v657_v22, 4  ;;  %v157_v2 = vrot.slane %v3444_v56, 3  ;;  %v961_v63 = vrot.slane %v960_v11, 1 }
  0xcf   :  { %v406_v30 = vmul.f32 %v3244_v46, %v3448_v9  ;;  %v438_v37 = vperm.slane %v3336_v18, 0  ;;  %v4215_v57 = vrot.slane %v3407_v25, 4  ;;  %v684_v41 = vmax.f32 %v682_v35, %v683_v26 }
  0xd0   :  { %v972_v31 = vadd.f32 %v971_v7, %v970_v54  ;;  %v696_v21 = vmax.f32 %v694_v1, %v695_v40  ;;  %v717_v19 = vmax.f32 %v715_v42, %v716_v24  ;;  %v710_v47 = vmax.f32 %v708_v10, %v709_v44  ;;  %v3466_v7 = vpop.permute.xlu2 %356 }
  0xd1   :  { %v3462_v33 = vadd.f32 %v4215_v57, %v3407_v25  ;;  %v895_v60 = vmul.f32 1.442695, %v851_v29  ;;  %v739_v45 = vrot.slane %v738_v27, 1  ;;  %v741_v43 = vsel %vm614_vm3, %v3453_v14, -inf  ;;  %4216 = vst [vmem:[#allocation28_spill] sm:$0xff] %v3466_v7 }
  0xd2   :  { %v3469_v54 = vadd.f32 %v938_v36, %v3399_v16  ;;  %v847_v0 = vsub.f32 %v3343_v8, %v677_v34  ;;  %v659_v58 = vmax.f32 %v657_v22, %v658_v38  ;;  %v449_v20 = vperm.slane %v157_v2, 0 }
  0xd3   :  { %v962_v25 = vadd.f32 %v961_v63, %v960_v11  ;;  %v691_v57 = vmax.f32 %v689_v48, %v690_v53  ;;  %v973_v35 = vrot.slane %v972_v31, 2  ;;  %v502_v1 = vadd.f32 %v438_v37, %v406_v30 }
  0xd4   :  { %v697_v42 = vrot.slane %v696_v21, 1  ;;  %v742_v24 = vrot.slane %v741_v43, 4  ;;  %v718_v10 = vrot.slane %v717_v19, 1  ;;  %v417_v26 = vmul.f32 %v3244_v46, %v3466_v7 }
  0xd5   :  { %v711_v40 = vrot.slane %v710_v47, 1  ;;  %v848_v44 = vsub.f32 %v3348_v12, %v684_v41  ;;  %2891 = vpow2.f32 %v895_v60  ;;  %v740_v16 = vmax.f32 %v738_v27, %v739_v45 }
  0xd6   :  { %v945_v36 = vrot.slane %v3434_v32, 2  ;;  %v887_v8 = vmul.f32 1.442695, %v847_v0  ;;  %v660_v34 = vrot.slane %v659_v58, 2  ;;  %v513_v29 = vadd.f32 %v449_v20, %v417_v26 }
  0xd7   :  { %2893 = vrcp.f32 %v962_v25  ;;  %v849_v48 = vsub.f32 %v3350_v13, %v691_v57  ;;  %v974_v11 = vadd.f32 %v973_v35, %v972_v31  ;;  %v566_v22 = vmul.f32 0.2, %v502_v1 }
  0xd8   :  { %v698_v53 = vmax.f32 %v696_v21, %v697_v42  ;;  %v743_v38 = vmax.f32 %v741_v43, %v742_v24  ;;  %v719_v2 = vmax.f32 %v717_v19, %v718_v10  ;;  %vm534_vm5 = vcmp.ge.f32.partialorder %v502_v1, 0.0  ;;  %v3502_v24 = vpop.permute.xlu2 %314 }
  0xd9   :  { %v4217_v63 = vrot.slane %v3416_v50, 4  ;;  %v712_v45 = vmax.f32 %v710_v47, %v711_v40  ;;  %v889_v27 = vmul.f32 1.442695, %v848_v44  ;;  %v856_v0 = vsub.f32 %v3418_v51, %v740_v16 }
  0xda   :  { %v952_v20 = vrot.slane %v3462_v33, 2  ;;  %2895 = vpow2.f32 %v887_v8  ;;  %v661_v30 = vmax.f32 %v659_v58, %v660_v34  ;;  %v577_v13 = vmul.f32 0.2, %v513_v29  ;;  %v3508_v8 = vpop.permute.xlu0 %272 }
  0xdb   :  { %v3480_v12 = vadd.f32 %v4217_v63, %v3416_v50  ;;  %v3484_v31 = vpop.eup %2891  ;;  %v891_v37 = vmul.f32 1.442695, %v849_v48  ;;  %v975_v43 = vrot.slane %v974_v11, 1  ;;  %vm545_vm6 = vcmp.ge.f32.partialorder %v513_v29, 0.0 }
  0xdc   :  { %v3486_v41 = vsel %vm534_vm5, %v502_v1, %v566_v22  ;;  %v940_v21 = vrot.slane %v3469_v54, 1  ;;  %v850_v50 = vsub.f32 %v3360_v6, %v698_v53  ;;  %v744_v19 = vrot.slane %v743_v38, 2 }
  0xdd   :  { %v853_v47 = vsub.f32 %v3432_v5, %v719_v2  ;;  %v2894_v51 = vpop.eup %2893  ;;  %v852_v60 = vsub.f32 %v3372_v39, %v712_v45  ;;  %2897 = vpow2.f32 %v889_v27  ;;  %v905_v58 = vmul.f32 1.442695, %v856_v0 }
  0xde   :  { %v152_v25 = vrot.slane %v3336_v18, 5  ;;  %v1019_v57 = vsel %vm614_vm3, %v3484_v31, 0.0  ;;  %v662_v35 = vrot.slane %v661_v30, 1  ;;  %v3495_v1 = vsel %vm545_vm6, %v513_v29, %v577_v13 }
  0xdf   :  { %v727_v42 = vsel %vm614_vm3, %v3486_v41, -inf  ;;  %v3500_v6 = vadd.f32 %v945_v36, %v3434_v32  ;;  %2899 = vpow2.f32 %v891_v37  ;;  %v976_v5 = vadd.f32 %v975_v43, %v974_v11 }
  0xe0   :  { %v147_v39 = vrot.slane %v3300_v55, 7  ;;  %v3505_v10 = vpop.eup %2895  ;;  %v1194_v26 = vmul.f32 %v2894_v51, %v3378_v49  ;;  %v893_v40 = vmul.f32 1.442695, %v850_v50  ;;  %v745_v44 = vmax.f32 %v743_v38, %v744_v19 }
  0xe1   :  { %4218 = vst [vmem:[#allocation29_spill] sm:$0xff] %v3500_v6  ;;  %v899_v16 = vmul.f32 1.442695, %v853_v47  ;;  %v897_v34 = vmul.f32 1.442695, %v852_v60  ;;  %v1020_v29 = vrot.slane %v1019_v57, 4  ;;  %2901 = vpow2.f32 %v905_v58 }
  0xe2   :  { %4219 = vst [vmem:[#allocation30_spill] sm:$0xff] %v3505_v10  ;;  %v804_v32 = vsel %vm614_vm3, %v3495_v1, -inf  ;;  %v728_v36 = vrot.slane %v727_v42, 4  ;;  %v663_v48 = vmax.f32 %v661_v30, %v662_v35  ;;  %v411_v55 = vmul.f32 %v3244_v46, %v3502_v24  ;;  %v3593_v6 = vpop.permute.xlu0 %335 }
  0xe3   :  { %v443_v11 = vperm.slane %v152_v25, 0  ;;  %v3514_v22 = vpop.eup %2897  ;;  %v991_v49 = vsel %vm614_vm3, %v3505_v10, 0.0  ;;  %2903 = vrcp.f32 %v976_v5  ;;  %v405_v53 = vmul.f32 %v3244_v46, %v3508_v8 }
  0xe4   :  { %4220 = vst [vmem:[#allocation31_spill] sm:$0xff] %v3514_v22  ;;  %v437_v38 = vperm.slane %v147_v39, 0  ;;  %v1226_v2 = vmul.f32 %v1194_v26, %v3257_v59  ;;  %v746_v63 = vrot.slane %v745_v44, 1  ;;  %2905 = vpow2.f32 %v899_v16  ;;  %v3543_v16 = vpop.permute.xlu1 %342 }
  0xe5   :  { %v805_v45 = vrot.slane %v804_v32, 4  ;;  %v3521_v27 = vpop.eup %2899  ;;  %v3524_v0 = vadd.f32 %v952_v20, %v3462_v33  ;;  %2907 = vpow2.f32 %v893_v40  ;;  %v1021_v30 = vadd.f32 %v1020_v29, %v1019_v57 }
  0xe6   :  { %4221 = vst [vmem:[#allocation32_spill] sm:$0xff] %v3521_v27  ;;  %v729_v13 = vmax.f32 %v727_v42, %v728_v36  ;;  %v992_v37 = vrot.slane %v991_v49, 4  ;;  %v998_v43 = vsel %vm614_vm3, %v3514_v22, 0.0  ;;  %v845_v50 = vsub.f32 %v3446_v17, %v663_v48 }
  0xe7   :  { %v507_v19 = vadd.f32 %v443_v11, %v411_v55  ;;  %v3530_v59 = vadd.f32 %v940_v21, %v3469_v54  ;;  %2909 = vpow2.f32 %v897_v34  ;;  %v501_v51 = vadd.f32 %v437_v38, %v405_v53  ;;  %v3533_v60 = vpop.eup %2901 }
  0xe8   :  { %v1276_v33 = vsel %vm614_vm3, %v1226_v2, 0.0  ;;  %v1005_v20 = vsel %vm614_vm3, %v3521_v27, 0.0  ;;  %v747_v58 = vmax.f32 %v745_v44, %v746_v63  ;;  %v806_v25 = vmax.f32 %v804_v32, %v805_v45 }
  0xe9   :  { %4222 = vst [vmem:[#allocation33_spill] sm:$0xff] %v3530_v59  ;;  %v2904_v57 = vpop.eup %2903  ;;  %v999_v35 = vrot.slane %v998_v43, 4  ;;  %v1022_v17 = vrot.slane %v1021_v30, 2  ;;  %v730_v42 = vrot.slane %v729_v13, 2  ;;  %v155_v54 = vrot.slane %v3444_v56, 1  ;;  %v3572_v59 = vpop.permute.xlu2 %377 }
  0xea   :  { %v3539_v21 = vpop.eup %2905  ;;  %v3541_v5 = vadd.f32 %v992_v37, %v991_v49  ;;  %v883_v39 = vmul.f32 1.442695, %v845_v50  ;;  %v571_v26 = vmul.f32 0.2, %v507_v19  ;;  %v565_v40 = vmul.f32 0.2, %v501_v51 }
  0xeb   :  { %v3545_v34 = vpop.eup %2907  ;;  %v1277_v29 = vrot.slane %v1276_v33, 4  ;;  %v1006_v44 = vrot.slane %v1005_v20, 4  ;;  %vm539_vm7 = vcmp.ge.f32.partialorder %v507_v19, 0.0  ;;  %vm533_vm8 = vcmp.ge.f32.partialorder %v501_v51, 0.0 }
  0xec   :  { %4223 = vst [vmem:[#allocation34_spill] sm:$0xff] %v3545_v34  ;;  %v1196_v32 = vmul.f32 %v2904_v57, %v3436_v3  ;;  %v857_v36 = vsub.f32 %v3453_v14, %v747_v58  ;;  %v1054_v48 = vsel %vm614_vm3, %v3533_v60, 0.0  ;;  %v807_v55 = vrot.slane %v806_v25, 2 }
  0xed   :  { %v3551_v11 = vpop.eup %2909  ;;  %v1033_v49 = vsel %vm614_vm3, %v3539_v21, 0.0  ;;  %v731_v53 = vmax.f32 %v729_v13, %v730_v42  ;;  %v415_v38 = vmul.f32 %v3244_v46, %v3543_v16  ;;  %v447_v2 = vperm.slane %v155_v54, 0 }
  0xee   :  { %4224 = vst [vmem:[#allocation35_spill] sm:$0xff] %v3551_v11  ;;  %v1023_v63 = vadd.f32 %v1022_v17, %v1021_v30  ;;  %2911 = vpow2.f32 %v883_v39  ;;  %v3557_v45 = vsel %vm539_vm7, %v507_v19, %v571_v26  ;;  %v3559_v3 = vsel %vm533_vm8, %v501_v51, %v565_v40 }
  0xef   :  { %v1000_v14 = vadd.f32 %v999_v35, %v998_v43  ;;  %v1012_v37 = vsel %vm614_vm3, %v3545_v34, 0.0  ;;  %v1055_v50 = vrot.slane %v1054_v48, 4  ;;  %v720_v58 = vsel %vm614_vm3, %v3559_v3, -inf }
  0xf0   :  { %v994_v13 = vrot.slane %v3541_v5, 2  ;;  %v1228_v57 = vmul.f32 %v1196_v32, %v3317_v28  ;;  %v1034_v42 = vrot.slane %v1033_v49, 4  ;;  %v721_v54 = vrot.slane %v720_v58, 4 }
  0xf1   :  { %v1007_v30 = vadd.f32 %v1006_v44, %v1005_v20  ;;  %v732_v17 = vrot.slane %v731_v53, 1  ;;  %v762_v19 = vsel %vm614_vm3, %v3557_v45, -inf  ;;  %v511_v51 = vadd.f32 %v447_v2, %v415_v38 }
  0xf2   :  { %v1278_v43 = vadd.f32 %v1277_v29, %v1276_v33  ;;  %v1024_v35 = vrot.slane %v1023_v63, 1  ;;  %v907_v39 = vmul.f32 1.442695, %v857_v36  ;;  %v808_v26 = vmax.f32 %v806_v25, %v807_v55 }
  0xf3   :  { %v1001_v40 = vrot.slane %v1000_v14, 2  ;;  %v1013_v47 = vrot.slane %v1012_v37, 4  ;;  %v1056_v7 = vadd.f32 %v1055_v50, %v1054_v48  ;;  %v722_v34 = vmax.f32 %v720_v58, %v721_v54 }
  0xf4   :  { %v3569_v27 = vpop.eup %2911  ;;  %v1290_v28 = vsel %vm614_vm3, %v1228_v57, 0.0  ;;  %v1035_v32 = vadd.f32 %v1034_v42, %v1033_v49  ;;  %v763_v22 = vrot.slane %v762_v19, 4  ;;  %v575_v20 = vmul.f32 0.2, %v511_v51 }
  0xf5   :  { %v733_v44 = vmax.f32 %v731_v53, %v732_v17  ;;  %v723_v10 = vrot.slane %v722_v34, 2  ;;  %vm543_vm9 = vcmp.ge.f32.partialorder %v511_v51, 0.0  ;;  %v160_v33 = vrot.slane %v3444_v56, 6 }
  0xf6   :  { %v1279_v29 = vrot.slane %v1278_v43, 2  ;;  %v1025_v25 = vadd.f32 %v1024_v35, %v1023_v63  ;;  %2913 = vpow2.f32 %v907_v39  ;;  %v809_v36 = vrot.slane %v808_v26, 1 }
  0xf7   :  { %v1291_v48 = vrot.slane %v1290_v28, 4  ;;  %v1057_v55 = vrot.slane %v1056_v7, 2  ;;  %v977_v38 = vsel %vm614_vm3, %v3569_v27, 0.0  ;;  %v724_v2 = vmax.f32 %v722_v34, %v723_v10 }
  0xf8   :  { %v764_v49 = vmax.f32 %v762_v19, %v763_v22  ;;  %v3577_v50 = vsel %vm543_vm9, %v511_v51, %v575_v20  ;;  %v420_v53 = vmul.f32 %v3244_v46, %v3572_v59  ;;  %v452_v58 = vperm.slane %v160_v33, 0 }
  0xf9   :  { %v3582_v57 = vadd.f32 %v994_v13, %v3541_v5  ;;  %v1008_v42 = vrot.slane %v1007_v30, 2  ;;  %v1036_v63 = vrot.slane %v1035_v32, 2  ;;  %v855_v54 = vsub.f32 %v3486_v41, %v733_v44 }
  0xfa   :  { %v1280_v17 = vadd.f32 %v1279_v29, %v1278_v43  ;;  %v3585_v35 = vadd.f32 %v1001_v40, %v1000_v14  ;;  %v3587_v39 = vadd.f32 %v1013_v47, %v1012_v37  ;;  %v978_v10 = vrot.slane %v977_v38, 4 }
  0xfb   :  { %2915 = vrcp.f32 %v1025_v25  ;;  %v810_v22 = vmax.f32 %v808_v26, %v809_v36  ;;  %v725_v34 = vrot.slane %v724_v2, 1  ;;  %v790_v19 = vsel %vm614_vm3, %v3577_v50, -inf }
  0xfc   :  { %4225 = vst [vmem:[#allocation36_spill] sm:$0xff] %v3585_v35  ;;  %v3591_v51 = vpop.eup %2913  ;;  %v1292_v5 = vadd.f32 %v1291_v48, %v1290_v28  ;;  %v1058_v13 = vadd.f32 %v1057_v55, %v1056_v7  ;;  %v765_v20 = vrot.slane %v764_v49, 2  ;;  %v516_v33 = vadd.f32 %v452_v58, %v420_v53 }
  0xfd   :  { %4226 = vst [vmem:[#allocation37_spill] sm:$0xff] %v3587_v39  ;;  %v3596_v14 = vadd.f32 %v1008_v42, %v1007_v30  ;;  %v1037_v47 = vadd.f32 %v1036_v63, %v1035_v32  ;;  %v903_v37 = vmul.f32 1.442695, %v855_v54  ;;  %v1281_v43 = vrot.slane %v1280_v17, 1  ;;  %v3609_v63 = vpop.permute.xlu1 %300 }
  0xfe   :  { %4227 = vst [vmem:[#allocation38_spill] sm:$0xff] %v3591_v51  ;;  %v979_v40 = vadd.f32 %v978_v10, %v977_v38  ;;  %v791_v44 = vrot.slane %v790_v19, 4  ;;  %v1061_v29 = vsel %vm614_vm3, %v3591_v51, 0.0  ;;  %v866_v7 = vsub.f32 %v3495_v1, %v810_v22 }
  0xff   :  { %v726_v28 = vmax.f32 %v724_v2, %v725_v34  ;;  %v414_v25 = vmul.f32 %v3244_v46, %v3593_v6  ;;  %v1293_v36 = vrot.slane %v1292_v5, 2  ;;  %v1059_v48 = vrot.slane %v1058_v13, 1 }
 0x100   :  { %v766_v30 = vmax.f32 %v764_v49, %v765_v20  ;;  %v580_v55 = vmul.f32 0.2, %v516_v33  ;;  %v1038_v53 = vrot.slane %v1037_v47, 1  ;;  %2917 = vpow2.f32 %v903_v37 }
 0x101   :  { %v2916_v32 = vpop.eup %2915  ;;  %vm548_vm10 = vcmp.ge.f32.partialorder %v516_v33, 0.0  ;;  %v446_v38 = vperm.slane %v3444_v56, 0  ;;  %v3607_v58 = vsel %vm614_vm3, %v3551_v11, 0.0  ;;  %v1062_v42 = vrot.slane %v1061_v29, 4 }
 0x102   :  { %v980_v1 = vrot.slane %v979_v40, 2  ;;  %v792_v2 = vmax.f32 %v790_v19, %v791_v44  ;;  %v925_v46 = vmul.f32 1.442695, %v866_v7  ;;  %v854_v54 = vsub.f32 %v3559_v3, %v726_v28  ;;  %v3619_v19 = vld [vmem:[%s4151_s2] ss:$0 sm:$0xff] }
 0x103   :  { %v510_v49 = vadd.f32 %v446_v38, %v414_v25  ;;  %v150_v10 = vrot.slane %v3336_v18, 3  ;;  %v1294_v22 = vadd.f32 %v1293_v36, %v1292_v5  ;;  %v1060_v34 = vadd.f32 %v1059_v48, %v1058_v13 }
 0x104   :  { %v767_v20 = vrot.slane %v766_v30, 1  ;;  %v3613_v37 = vsel %vm548_vm10, %v516_v33, %v580_v55  ;;  %v1282_v26 = vadd.f32 %v1281_v43, %v1280_v17  ;;  %v1203_v41 = vmul.f32 %v2916_v32, %v3484_v31 }
 0x105   :  { %v1039_v51 = vadd.f32 %v1038_v53, %v1037_v47  ;;  %v409_v3 = vmul.f32 %v3619_v19, %v3609_v63  ;;  %v981_v44 = vadd.f32 %v980_v1, %v979_v40  ;;  %v793_v7 = vrot.slane %v792_v2, 2 }
 0x106   :  { %vm542_vm11 = vcmp.ge.f32.partialorder %v510_v49, 0.0  ;;  %v574_v5 = vmul.f32 0.2, %v510_v49  ;;  %v3623_v13 = vpop.eup %2917  ;;  %2919 = vpow2.f32 %v925_v46  ;;  %v901_v33 = vmul.f32 1.442695, %v854_v54 }
 0x107   :  { %v825_v31 = vsel %vm614_vm3, %v3613_v37, -inf  ;;  %v441_v17 = vperm.slane %v150_v10, 0  ;;  %v1295_v47 = vrot.slane %v1294_v22, 1  ;;  %v1063_v43 = vadd.f32 %v1062_v42, %v1061_v29 }
 0x108   :  { %2921 = vrcp.f32 %v1060_v34  ;;  %v768_v28 = vmax.f32 %v766_v30, %v767_v20  ;;  %v1235_v25 = vmul.f32 %v1203_v41, %v3333_v62  ;;  %v3628_v36 = vsel %vm542_vm11, %v510_v49, %v574_v5 }
 0x109   :  { %2923 = vrcp.f32 %v1039_v51  ;;  %v505_v40 = vadd.f32 %v441_v17, %v409_v3  ;;  %v982_v48 = vrot.slane %v981_v44, 1  ;;  %v1047_v55 = vsel %vm614_vm3, %v3623_v13, 0.0  ;;  %v3636_v51 = vpop.permute.xlu0 %349 }
 0x10a   :  { %v794_v32 = vmax.f32 %v792_v2, %v793_v7  ;;  %v826_v53 = vrot.slane %v825_v31, 4  ;;  %2925 = vpow2.f32 %v901_v33  ;;  %v1482_v29 = vpack.c.bf16 %v1282_v26, %v1282_v26 }
 0x10b   :  { %vm537_vm12 = vcmp.ge.f32.partialorder %v505_v40, 0.0  ;;  %v569_v1 = vmul.f32 0.2, %v505_v40  ;;  %v1064_v42 = vrot.slane %v1063_v43, 2  ;;  %v860_v30 = vsub.f32 %v3557_v45, %v768_v28 }
 0x10c   :  { %v783_v62 = vsel %vm614_vm3, %v3628_v36, -inf  ;;  %v3638_v41 = vpop.eup %2919  ;;  %v1339_v46 = vsel %vm614_vm3, %v1235_v25, 0.0  ;;  %v1048_v2 = vrot.slane %v1047_v55, 4  ;;  %v156_v49 = vrot.slane %v3444_v56, 2 }
 0x10d   :  { %4228 = vst [vmem:[#allocation39_spill] sm:$0xff] %v3638_v41  ;;  %v3641_v54 = vsel %vm537_vm12, %v505_v40, %v569_v1  ;;  %v1296_v34 = vadd.f32 %v1295_v47, %v1294_v22  ;;  %v983_v26 = vadd.f32 %v982_v48, %v981_v44  ;;  %v795_v20 = vrot.slane %v794_v32, 1 }
 0x10e   :  { %v2922_v10 = vpop.eup %2921  ;;  %v827_v3 = vmax.f32 %v825_v31, %v826_v53  ;;  %v784_v7 = vrot.slane %v783_v62, 4  ;;  %v748_v5 = vsel %vm614_vm3, %v3641_v54, -inf  ;;  %v416_v33 = vmul.f32 %v3619_v19, %v3636_v51 }
 0x10f   :  { %v2924_v45 = vpop.eup %2923  ;;  %v448_v17 = vperm.slane %v156_v49, 0  ;;  %v4229_v28 = vrot.slane %v3582_v57, 1  ;;  %v1340_v22 = vrot.slane %v1339_v46, 4  ;;  %v913_v44 = vmul.f32 1.442695, %v860_v30 }
 0x110   :  { %v3654_v47 = vpop.eup %2925  ;;  %v1049_v31 = vadd.f32 %v1048_v2, %v1047_v55  ;;  %v1208_v48 = vmul.f32 %v2922_v10, %v3533_v60  ;;  %v749_v53 = vrot.slane %v748_v5, 4  ;;  %v3657_v38 = vunpack.c.l.b16 %v1482_v29  ;;  %v3666_v55 = vpop.permute.xlu1 %363 }
 0x111   :  { %v3651_v25 = vadd.f32 %v4229_v28, %v3582_v57  ;;  %v512_v1 = vadd.f32 %v448_v17, %v416_v33  ;;  %v3659_v11 = vadd.f32 %v1064_v42, %v1063_v43  ;;  %v796_v49 = vmax.f32 %v794_v32, %v795_v20 }
 0x112   :  { %4230 = vst [vmem:[#allocation40_spill] sm:$0xff] %v3657_v38  ;;  %v828_v39 = vrot.slane %v827_v3, 2  ;;  %v1484_v35 = vpack.c.bf16 %v1296_v34, %v1296_v34  ;;  %2927 = vrcp.f32 %v983_v26  ;;  %v1124_v57 = vsel %vm614_vm3, %v3638_v41, 0.0 }
 0x113   :  { %4231 = vst [vmem:[#allocation41_spill] sm:$0xff] %v3659_v11  ;;  %v785_v28 = vmax.f32 %v783_v62, %v784_v7  ;;  %v1341_v30 = vadd.f32 %v1340_v22, %v1339_v46  ;;  %v1205_v40 = vmul.f32 %v2924_v45, %v3539_v21  ;;  %2929 = vpow2.f32 %v913_v44  ;;  %v3689_v11 = vpop.permute.xlu0 %307 }
 0x114   :  { %v1040_v60 = vsel %vm614_vm3, %v3654_v47, 0.0  ;;  %v1050_v29 = vrot.slane %v1049_v31, 2  ;;  %v1240_v43 = vmul.f32 %v1208_v48, %v3355_v23  ;;  %v750_v32 = vmax.f32 %v748_v5, %v749_v53  ;;  %4233 = vst [vmem:[#allocation43_spill] sm:$0xff] %v3689_v11 }
 0x115   :  { %vm544_vm13 = vcmp.ge.f32.partialorder %v512_v1, 0.0  ;;  %v864_v42 = vsub.f32 %v3577_v50, %v796_v49  ;;  %v829_v2 = vmax.f32 %v827_v3, %v828_v39  ;;  %v576_v10 = vmul.f32 0.2, %v512_v1 }
 0x116   :  { %v158_v62 = vrot.slane %v3444_v56, 4  ;;  %v1125_v46 = vrot.slane %v1124_v57, 4  ;;  %v1041_v34 = vrot.slane %v1040_v60, 4  ;;  %v786_v21 = vrot.slane %v785_v28, 2 }
 0x117   :  { %v418_v26 = vmul.f32 %v3619_v19, %v3666_v55  ;;  %v1342_v20 = vrot.slane %v1341_v30, 2  ;;  %v1237_v45 = vmul.f32 %v1205_v40, %v3392_v4  ;;  %v3674_v7 = vsel %vm544_vm13, %v512_v1, %v576_v10 }
 0x118   :  { %v450_v23 = vperm.slane %v158_v62, 0  ;;  %v2928_v5 = vpop.eup %2927  ;;  %v1051_v33 = vadd.f32 %v1050_v29, %v1049_v31  ;;  %v1374_v50 = vsel %vm614_vm3, %v1240_v43, 0.0  ;;  %v751_v39 = vrot.slane %v750_v32, 2 }
 0x119   :  { %v797_v3 = vsel %vm614_vm3, %v3674_v7, -inf  ;;  %v3679_v17 = vpop.eup %2929  ;;  %v921_v22 = vmul.f32 1.442695, %v864_v42  ;;  %v830_v44 = vrot.slane %v829_v2, 1  ;;  %v3681_v49 = vunpack.c.l.b16 %v1484_v35 }
 0x11a   :  { %v798_v48 = vrot.slane %v797_v3, 4  ;;  %v514_v53 = vadd.f32 %v450_v23, %v418_v26  ;;  %v3683_v4 = vadd.f32 %v1125_v46, %v1124_v57  ;;  %v1042_v40 = vadd.f32 %v1041_v34, %v1040_v60 }
 0x11b   :  { %4232 = vst [vmem:[#allocation42_spill] sm:$0xff] %v3681_v49  ;;  %v787_v1 = vmax.f32 %v785_v28, %v786_v21  ;;  %v1343_v10 = vadd.f32 %v1342_v20, %v1341_v30  ;;  %v1353_v31 = vsel %vm614_vm3, %v1237_v45, 0.0  ;;  %v1375_v29 = vrot.slane %v1374_v50, 4 }
 0x11c   :  { %v799_v43 = vmax.f32 %v797_v3, %v798_v48  ;;  %v1197_v62 = vmul.f32 %v2928_v5, %v3569_v27  ;;  %v1052_v41 = vrot.slane %v1051_v33, 1  ;;  %v1082_v42 = vsel %vm614_vm3, %v3679_v17, 0.0 }
 0x11d   :  { %v752_v38 = vmax.f32 %v750_v32, %v751_v39  ;;  %2931 = vpow2.f32 %v921_v22  ;;  %v831_v35 = vmax.f32 %v829_v2, %v830_v44  ;;  %vm546_vm14 = vcmp.ge.f32.partialorder %v514_v53, 0.0 }
 0x11e   :  { %v800_v57 = vrot.slane %v799_v43, 2  ;;  %v1043_v60 = vrot.slane %v1042_v40, 2  ;;  %v788_v28 = vrot.slane %v787_v1, 1  ;;  %v578_v30 = vmul.f32 0.2, %v514_v53 }
 0x11f   :  { %v151_v46 = vrot.slane %v3336_v18, 4  ;;  %v1344_v34 = vrot.slane %v1343_v10, 1  ;;  %v1354_v21 = vrot.slane %v1353_v31, 4  ;;  %v410_v27 = vmul.f32 %v3619_v19, %v3689_v11 }
 0x120   :  { %v801_v26 = vmax.f32 %v799_v43, %v800_v57  ;;  %v1053_v20 = vadd.f32 %v1052_v41, %v1051_v33  ;;  %v1083_v45 = vrot.slane %v1082_v42, 4  ;;  %v753_v32 = vrot.slane %v752_v38, 1 }
 0x121   :  { %v3694_v23 = vsel %vm546_vm14, %v514_v53, %v578_v30  ;;  %v1229_v2 = vmul.f32 %v1197_v62, %v3420_v52  ;;  %v869_v5 = vsub.f32 %v3613_v37, %v831_v35  ;;  %v442_v3 = vperm.slane %v151_v46, 0 }
 0x122   :  { %v811_v39 = vsel %vm614_vm3, %v3694_v23, -inf  ;;  %v1376_v22 = vadd.f32 %v1375_v29, %v1374_v50  ;;  %v1044_v44 = vadd.f32 %v1043_v60, %v1042_v40  ;;  %v789_v48 = vmax.f32 %v787_v1, %v788_v28  ;;  %v3704_v29 = vpop.permute.xlu1 %321 }
 0x123   :  { %v812_v43 = vrot.slane %v811_v39, 4  ;;  %v3700_v57 = vpop.eup %2931  ;;  %v1345_v49 = vadd.f32 %v1344_v34, %v1343_v10  ;;  %v1355_v41 = vadd.f32 %v1354_v21, %v1353_v31  ;;  %v802_v33 = vrot.slane %v801_v26, 1  ;;  %4234 = vst [vmem:[#allocation44_spill] sm:$0xff] %v3704_v29 }
 0x124   :  { %v506_v11 = vadd.f32 %v442_v3, %v410_v27  ;;  %2933 = vrcp.f32 %v1053_v20  ;;  %v1084_v53 = vadd.f32 %v1083_v45, %v1082_v42  ;;  %v754_v30 = vmax.f32 %v752_v38, %v753_v32 }
 0x125   :  { %v813_v52 = vmax.f32 %v811_v39, %v812_v43  ;;  %v1297_v37 = vsel %vm614_vm3, %v1229_v2, 0.0  ;;  %v931_v62 = vmul.f32 1.442695, %v869_v5  ;;  %v1377_v46 = vrot.slane %v1376_v22, 2 }
 0x126   :  { %vm538_vm15 = vcmp.ge.f32.partialorder %v506_v11, 0.0  ;;  %v570_v35 = vmul.f32 0.2, %v506_v11  ;;  %v1045_v50 = vrot.slane %v1044_v44, 1  ;;  %v863_v40 = vsub.f32 %v3628_v36, %v789_v48 }
 0x127   :  { %v814_v1 = vrot.slane %v813_v52, 2  ;;  %v1110_v10 = vsel %vm614_vm3, %v3700_v57, 0.0  ;;  %v803_v31 = vmax.f32 %v801_v26, %v802_v33  ;;  %v153_v38 = vrot.slane %v3336_v18, 6 }
 0x128   :  { %v3708_v60 = vsel %vm538_vm15, %v506_v11, %v570_v35  ;;  %v1356_v42 = vrot.slane %v1355_v41, 2  ;;  %v1298_v28 = vrot.slane %v1297_v37, 4  ;;  %v1085_v34 = vrot.slane %v1084_v53, 2 }
 0x129   :  { %v858_v21 = vsub.f32 %v3641_v54, %v754_v30  ;;  %2935 = vpow2.f32 %v931_v62  ;;  %v815_v27 = vmax.f32 %v813_v52, %v814_v1  ;;  %v755_v36 = vsel %vm614_vm3, %v3708_v60, -inf }
 0x12a   :  { %v412_v20 = vmul.f32 %v3619_v19, %v3704_v29  ;;  %v2934_v45 = vpop.eup %2933  ;;  %v1491_v32 = vpack.c.bf16 %v1345_v49, %v1345_v49  ;;  %v1111_v26 = vrot.slane %v1110_v10, 4  ;;  %v919_v11 = vmul.f32 1.442695, %v863_v40  ;;  %v3718_v29 = vpop.permute.xlu0 %370 }
 0x12b   :  { %v756_v2 = vrot.slane %v755_v36, 4  ;;  %v1378_v5 = vadd.f32 %v1377_v46, %v1376_v22  ;;  %v1046_v39 = vadd.f32 %v1045_v50, %v1044_v44  ;;  %v865_v3 = vsub.f32 %v3674_v7, %v803_v31 }
 0x12c   :  { %v444_v48 = vperm.slane %v153_v38, 0  ;;  %v1357_v43 = vadd.f32 %v1356_v42, %v1355_v41  ;;  %v909_v54 = vmul.f32 1.442695, %v858_v21  ;;  %v816_v33 = vrot.slane %v815_v27, 1 }
 0x12d   :  { %v757_v30 = vmax.f32 %v755_v36, %v756_v2  ;;  %v1299_v52 = vadd.f32 %v1298_v28, %v1297_v37  ;;  %v1207_v62 = vmul.f32 %v2934_v45, %v3623_v13  ;;  %v1086_v35 = vadd.f32 %v1085_v34, %v1084_v53 }
 0x12e   :  { %v508_v1 = vadd.f32 %v444_v48, %v412_v20  ;;  %v1112_v49 = vadd.f32 %v1111_v26, %v1110_v10  ;;  %2937 = vpow2.f32 %v919_v11  ;;  %v159_v22 = vrot.slane %v3444_v56, 5 }
 0x12f   :  { %v758_v40 = vrot.slane %v757_v30, 2  ;;  %v3721_v44 = vpop.eup %2935  ;;  %2939 = vrcp.f32 %v1046_v39  ;;  %v923_v7 = vmul.f32 1.442695, %v865_v3  ;;  %v817_v37 = vmax.f32 %v815_v27, %v816_v33 }
 0x130   :  { %vm540_vm0 = vcmp.ge.f32.partialorder %v508_v1, 0.0  ;;  %v572_v41 = vmul.f32 0.2, %v508_v1  ;;  %2941 = vpow2.f32 %v909_v54  ;;  %v419_v13 = vmul.f32 %v3619_v19, %v3718_v29 }
 0x131   :  { %v3726_v53 = vunpack.c.l.b16 %v1491_v32  ;;  %v1358_v50 = vrot.slane %v1357_v43, 1  ;;  %v1379_v10 = vrot.slane %v1378_v5, 1  ;;  %v759_v31 = vmax.f32 %v757_v30, %v758_v40 }
 0x132   :  { %v1300_v38 = vrot.slane %v1299_v52, 2  ;;  %v1145_v42 = vsel %vm614_vm3, %v3721_v44, 0.0  ;;  %v3730_v28 = vsel %vm540_vm0, %v508_v1, %v572_v41  ;;  %v451_v34 = vperm.slane %v159_v22, 0 }
 0x133   :  { %4235 = vst [vmem:[#allocation45_spill] sm:$0xff] %v3726_v53  ;;  %v1239_v21 = vmul.f32 %v1207_v62, %v3448_v9  ;;  %v1087_v36 = vrot.slane %v1086_v35, 1  ;;  %v1113_v20 = vrot.slane %v1112_v49, 2  ;;  %2943 = vpow2.f32 %v923_v7 }
 0x134   :  { %v3733_v27 = vpop.eup %2937  ;;  %v867_v45 = vsub.f32 %v3694_v23, %v817_v37  ;;  %v760_v32 = vrot.slane %v759_v31, 1  ;;  %v769_v26 = vsel %vm614_vm3, %v3730_v28, -inf  ;;  %v515_v11 = vadd.f32 %v451_v34, %v419_v13  ;;  %v3757_v34 = vpop.permute.xlu1 %384 }
 0x135   :  { %v2940_v2 = vpop.eup %2939  ;;  %v1359_v39 = vadd.f32 %v1358_v50, %v1357_v43  ;;  %v3738_v3 = vadd.f32 %v1379_v10, %v1378_v5  ;;  %v1146_v48 = vrot.slane %v1145_v42, 4  ;;  %v770_v54 = vrot.slane %v769_v26, 4 }
 0x136   :  { %v3740_v33 = vpop.eup %2941  ;;  %v3742_v9 = vadd.f32 %v1300_v38, %v1299_v52  ;;  %v761_v30 = vmax.f32 %v759_v31, %v760_v32  ;;  %vm547_vm1 = vcmp.ge.f32.partialorder %v515_v11, 0.0  ;;  %v579_v62 = vmul.f32 0.2, %v515_v11 }
 0x137   :  { %4236 = vst [vmem:[#allocation46_spill] sm:$0xff] %v3738_v3  ;;  %v1367_v23 = vsel %vm614_vm3, %v1239_v21, 0.0  ;;  %v1088_v1 = vadd.f32 %v1087_v36, %v1086_v35  ;;  %v1114_v40 = vadd.f32 %v1113_v20, %v1112_v49  ;;  %v1103_v22 = vsel %vm614_vm3, %v3733_v27, 0.0 }
 0x138   :  { %v927_v7 = vmul.f32 1.442695, %v867_v45  ;;  %v859_v5 = vsub.f32 %v3708_v60, %v761_v30  ;;  %v771_v43 = vmax.f32 %v769_v26, %v770_v54  ;;  %v3748_v41 = vsel %vm547_vm1, %v515_v11, %v579_v62 }
 0x139   :  { %v3750_v37 = vpop.eup %2943  ;;  %v1206_v52 = vmul.f32 %v2940_v2, %v3654_v47  ;;  %v1147_v13 = vadd.f32 %v1146_v48, %v1145_v42  ;;  %v1068_v50 = vsel %vm614_vm3, %v3740_v33, 0.0  ;;  %v818_v35 = vsel %vm614_vm3, %v3748_v41, -inf }
 0x13a   :  { %v1104_v49 = vrot.slane %v1103_v22, 4  ;;  %v911_v10 = vmul.f32 1.442695, %v859_v5  ;;  %v772_v31 = vrot.slane %v771_v43, 2  ;;  %v819_v38 = vrot.slane %v818_v35, 4 }
 0x13b   :  { %v1368_v60 = vrot.slane %v1367_v23, 4  ;;  %2945 = vrcp.f32 %v1088_v1  ;;  %v1115_v21 = vrot.slane %v1114_v40, 1  ;;  %v161_v36 = vrot.slane %v3444_v56, 7 }
 0x13c   :  { %v1069_v20 = vrot.slane %v1068_v50, 4  ;;  %v1117_v47 = vsel %vm614_vm3, %v3750_v37, 0.0  ;;  %2947 = vpow2.f32 %v927_v7  ;;  %v773_v42 = vmax.f32 %v771_v43, %v772_v31 }
 0x13d   :  { %v1148_v45 = vrot.slane %v1147_v13, 2  ;;  %2949 = vpow2.f32 %v911_v10  ;;  %v820_v32 = vmax.f32 %v818_v35, %v819_v38  ;;  %v421_v26 = vmul.f32 %v3619_v19, %v3757_v34 }
 0x13e   :  { %v1493_v11 = vpack.c.bf16 %v1359_v39, %v1359_v39  ;;  %v1238_v2 = vmul.f32 %v1206_v52, %v3508_v8  ;;  %v1105_v48 = vadd.f32 %v1104_v49, %v1103_v22  ;;  %v774_v54 = vrot.slane %v773_v42, 1 }
 0x13f   :  { %v1118_v30 = vrot.slane %v1117_v47, 4  ;;  %v821_v62 = vrot.slane %v820_v32, 2  ;;  %v453_v1 = vperm.slane %v161_v36, 0  ;;  %v1369_v5 = vadd.f32 %v1368_v60, %v1367_v23 }
 0x140   :  { %v1116_v7 = vadd.f32 %v1115_v21, %v1114_v40  ;;  %v1070_v43 = vadd.f32 %v1069_v20, %v1068_v50  ;;  %v775_v31 = vmax.f32 %v773_v42, %v774_v54  ;;  %v1302_v35 = vrot.slane %v3742_v9, 1 }
 0x141   :  { %v2946_v10 = vpop.eup %2945  ;;  %v1149_v38 = vadd.f32 %v1148_v45, %v1147_v13  ;;  %v822_v46 = vmax.f32 %v820_v32, %v821_v62  ;;  %v517_v39 = vadd.f32 %v453_v1, %v421_v26  ;;  %v3770_v8 = vunpack.c.l.b16 %v1493_v11  ;;  %v3779_v26 = vpop.permute.xlu0 %328 }
 0x142   :  { %v3768_v53 = vpop.eup %2947  ;;  %v1360_v22 = vsel %vm614_vm3, %v1238_v2, 0.0  ;;  %v1106_v52 = vrot.slane %v1105_v48, 2  ;;  %v861_v49 = vsub.f32 %v3730_v28, %v775_v31  ;;  %v1119_v23 = vadd.f32 %v1118_v30, %v1117_v47 }
 0x143   :  { %v3774_v36 = vpop.eup %2949  ;;  %v823_v40 = vrot.slane %v822_v46, 1  ;;  %vm549_vm2 = vcmp.ge.f32.partialorder %v517_v39, 0.0  ;;  %v581_v50 = vmul.f32 0.2, %v517_v39  ;;  %v1370_v60 = vrot.slane %v1369_v5, 2 }
 0x144   :  { %v1212_v13 = vmul.f32 %v2946_v10, %v3679_v17  ;;  %2951 = vrcp.f32 %v1116_v7  ;;  %v1071_v21 = vrot.slane %v1070_v43, 2  ;;  %v1361_v20 = vrot.slane %v1360_v22, 4 }
 0x145   :  { %v1150_v42 = vrot.slane %v1149_v38, 1  ;;  %v824_v45 = vmax.f32 %v822_v46, %v823_v40  ;;  %v3777_v32 = vsel %vm549_vm2, %v517_v39, %v581_v50  ;;  %v1131_v28 = vsel %vm614_vm3, %v3768_v53, 0.0 }
 0x146   :  { %v1075_v47 = vsel %vm614_vm3, %v3774_v36, 0.0  ;;  %v915_v11 = vmul.f32 1.442695, %v861_v49  ;;  %v154_v2 = vrot.slane %v3336_v18, 7  ;;  %v1107_v54 = vadd.f32 %v1106_v52, %v1105_v48 }
 0x147   :  { %v1120_v17 = vrot.slane %v1119_v23, 2  ;;  %v868_v30 = vsub.f32 %v3748_v41, %v824_v45  ;;  %v832_v46 = vsel %vm614_vm3, %v3777_v32, -inf  ;;  %v1371_v62 = vadd.f32 %v1370_v60, %v1369_v5 }
 0x148   :  { %v1244_v1 = vmul.f32 %v1212_v13, %v3502_v24  ;;  %v1072_v7 = vadd.f32 %v1071_v21, %v1070_v43  ;;  %v413_v31 = vmul.f32 %v3619_v19, %v3779_v26  ;;  %v3793_v10 = vadd.f32 %v1302_v35, %v3742_v9 }
 0x149   :  { %v1132_v39 = vrot.slane %v1131_v28, 4  ;;  %v1076_v49 = vrot.slane %v1075_v47, 4  ;;  %v833_v18 = vrot.slane %v832_v46, 4  ;;  %v1362_v52 = vadd.f32 %v1361_v20, %v1360_v22 }
 0x14a   :  { %v2952_v48 = vpop.eup %2951  ;;  %v1151_v40 = vadd.f32 %v1150_v42, %v1149_v38  ;;  %2953 = vpow2.f32 %v915_v11  ;;  %v445_v41 = vperm.slane %v154_v2, 0  ;;  %v1108_v50 = vrot.slane %v1107_v54, 1 }
 0x14b   :  { %v1121_v45 = vadd.f32 %v1120_v17, %v1119_v23  ;;  %v929_v5 = vmul.f32 1.442695, %v868_v30  ;;  %v834_v60 = vmax.f32 %v832_v46, %v833_v18  ;;  %v1372_v24 = vrot.slane %v1371_v62, 1 }
 0x14c   :  { %v3796_v43 = vsel %vm614_vm3, %v1244_v1, 0.0  ;;  %v1073_v19 = vrot.slane %v1072_v7, 1  ;;  %v509_v13 = vadd.f32 %v445_v41, %v413_v31  ;;  %v1133_v9 = vadd.f32 %v1132_v39, %v1131_v28 }
 0x14d   :  { %v1077_v35 = vadd.f32 %v1076_v49, %v1075_v47  ;;  %v835_v21 = vrot.slane %v834_v60, 2  ;;  %v669_v56 = vrot.slane %v3389_v15, 1  ;;  %v1363_v3 = vrot.slane %v1362_v52, 2 }
 0x14e   :  { %2955 = vrcp.f32 %v1151_v40  ;;  %vm541_vm4 = vcmp.ge.f32.partialorder %v509_v13, 0.0  ;;  %v573_v38 = vmul.f32 0.2, %v509_v13  ;;  %v1216_v22 = vmul.f32 %v2952_v48, %v3700_v57  ;;  %v2553_v57 = vld [vmem:[%s4152_s3 + $0x10] sm:$0xf] }
 0x14f   :  { %v1109_v23 = vadd.f32 %v1108_v50, %v1107_v54  ;;  %v1122_v20 = vrot.slane %v1121_v45, 1  ;;  %2957 = vpow2.f32 %v929_v5  ;;  %v1403_v11 = vrot.slane %v3796_v43, 4  ;;  %v2807_v54 = vld [vmem:[%s4152_s3 + $0x14] sm:$0xf0] }
 0x150   :  { %v3800_v42 = vpop.eup %2953  ;;  %v1074_v2 = vadd.f32 %v1073_v19, %v1072_v7  ;;  %v836_v17 = vmax.f32 %v834_v60, %v835_v21  ;;  %v3803_v28 = vsel %vm541_vm4, %v509_v13, %v573_v38  ;;  %v1485_v47 = vpack.c.bf16 %v3793_v10, %v3793_v10  ;;  %v2806_v10 = vld [vmem:[%s4152_s3 + $0x14] sm:$0xf]  ;;  %v2805_v19 = vld [vmem:[%s4152_s3 + $0x4] sm:$0xf0]  ;;  %v2804_v13 = vld [vmem:[%s4152_s3 + $0x4] sm:$0xf] }
 0x151   :  { %v1134_v30 = vrot.slane %v1133_v9, 2  ;;  %v1078_v46 = vrot.slane %v1077_v35, 2  ;;  %v670_v1 = vmax.f32 %v3389_v15, %v669_v56  ;;  %v1364_v31 = vadd.f32 %v1363_v3, %v1362_v52  ;;  %v2555_v15 = vld [vmem:[%s4152_s3 + $0x18] sm:$0xf0] }
 0x152   :  { %v837_v7 = vrot.slane %v836_v17, 1  ;;  %v776_v39 = vsel %vm614_vm3, %v3803_v28, -inf  ;;  %v2554_v49 = vor.u32 %v2807_v54, %v2553_v57  ;;  %v1248_v18 = vmul.f32 %v1216_v22, %v3543_v16 }
 0x153   :  { %2959 = vrcp.f32 %v1109_v23  ;;  %v1123_v48 = vadd.f32 %v1122_v20, %v1121_v45  ;;  %v1089_v40 = vsel %vm614_vm3, %v3800_v42, 0.0  ;;  %v777_v52 = vrot.slane %v776_v39, 4  ;;  %v2545_v45 = vld [vmem:[%s4152_s3] sm:$0xf] }
 0x154   :  { %v2956_v3 = vpop.eup %2955  ;;  %2961 = vrcp.f32 %v1074_v2  ;;  %v838_v56 = vmax.f32 %v836_v17, %v837_v7  ;;  %1654 = vmatpush.bf16.msra.mxu1 %v2554_v49  ;;  %v2558_v41 = vor.u32 %v2806_v10, %v2555_v15  ;;  %v3827_v5 = vadd.f32 %v1372_v24, %v1371_v62 }
 0x155   :  { %v3825_v50 = vpop.eup %2957  ;;  %v1135_v16 = vadd.f32 %v1134_v30, %v1133_v9  ;;  %v1079_v60 = vadd.f32 %v1078_v46, %v1077_v35  ;;  %v846_v21 = vsub.f32 %v3302_v61, %v670_v1  ;;  %v1090_v38 = vrot.slane %v1089_v40, 4  ;;  %v2547_v35 = vld [vmem:[%s4152_s3 + $0x8] sm:$0xf0]  ;;  %s3131_s3 = smov [#allocation8]  }
 0x156   :  { %v870_v62 = vsub.f32 %v3777_v32, %v838_v56  ;;  %v778_v24 = vmax.f32 %v776_v39, %v777_v52  ;;  %1673 = vmatpush.bf16.msra.mxu2 %v2558_v41  ;;  %v2546_v9 = vor.u32 %v2805_v19, %v2545_v45  ;;  %v3843_v22 = vunpack.c.l.b16 %v1485_v47  ;;  %s2528_s28 = sshll.u32 %s3131_s3, 4  ;;  %s2529_s28 = int_to_ptr.vmem [resolvable:$true] %s2528_s28 }
 0x157   :  { %v1365_v23 = vrot.slane %v1364_v31, 1  ;;  %2963 = vrcp.f32 %v1123_v48  ;;  %v2550_v20 = vor.u32 %v2804_v13, %v2547_v35  ;;  %v1430_v2 = vsel %vm614_vm3, %v1248_v18, 0.0 }
 0x158   :  { %v1221_v17 = vmul.f32 %v2956_v3, %v3721_v44  ;;  %v1138_v61 = vsel %vm614_vm3, %v3825_v50, 0.0  ;;  %v779_v32 = vrot.slane %v778_v24, 2  ;;  %1655 = vmatpush.bf16.msra.mxu1 %v2546_v9  ;;  %v3850_v46 = vadd.f32 %v1403_v11, %v3796_v43 }
 0x159   :  { %v2960_v30 = vpop.eup %2959  ;;  %v1136_v57 = vrot.slane %v1135_v16, 1  ;;  %v933_v54 = vmul.f32 1.442695, %v870_v62  ;;  %v885_v47 = vmul.f32 1.442695, %v846_v21  ;;  %v1495_v7 = vpack.c.bf16 %v3827_v5, %v3827_v5 }
 0x15a   :  { %v2962_v1 = vpop.eup %2961  ;;  %v1080_v39 = vrot.slane %v1079_v60, 1  ;;  %v1091_v49 = vadd.f32 %v1090_v38, %v1089_v40  ;;  %v780_v10 = vmax.f32 %v778_v24, %v779_v32  ;;  %1674 = vmatpush.bf16.msra.mxu2 %v2550_v20  ;;  %v3854_v44 = vadd.f32 %v1365_v23, %v1364_v31  ;;  %v4237_v24 = vld [vmem:[#allocation29_spill] sm:$0xff] }
 0x15b   :  { %v1431_v18 = vrot.slane %v1430_v2, 4  ;;  %v1139_v48 = vrot.slane %v1138_v61, 4  ;;  %v966_v15 = vrot.slane %v3480_v12, 2  ;;  %v1253_v43 = vmul.f32 %v1221_v17, %v3572_v59 }
 0x15c   :  { %v1215_v11 = vmul.f32 %v2960_v30, %v3733_v27  ;;  %v781_v3 = vrot.slane %v780_v10, 1  ;;  %2965 = vpow2.f32 %v885_v47  ;;  %v1210_v52 = vmul.f32 %v2962_v1, %v3740_v33  ;;  %v4240_v30 = vld [vmem:[#allocation33_spill] sm:$0xff] }
 0x15d   :  { %v2964_v56 = vpop.eup %2963  ;;  %v1137_v41 = vadd.f32 %v1136_v57, %v1135_v16  ;;  %2967 = vpow2.f32 %v933_v54  ;;  %v967_v40 = vadd.f32 %v966_v15, %v3480_v12  ;;  %v1081_v45 = vadd.f32 %v1080_v39, %v1079_v60 }
 0x15e   :  { %v1092_v31 = vrot.slane %v1091_v49, 2  ;;  %v782_v19 = vmax.f32 %v780_v10, %v781_v3  ;;  %v954_v13 = vrot.slane %v3524_v0, 1  ;;  %v1405_v21 = vrot.slane %v3850_v46, 2 }
 0x15f   :  { %v1494_v59 = vpack.c.bf16 %v3854_v44, %v3854_v44  ;;  %v3865_v27 = vadd.f32 %v1431_v18, %v1430_v2  ;;  %v1140_v38 = vadd.f32 %v1139_v48, %v1138_v61  ;;  %v3868_v62 = vsel %vm614_vm3, %v1253_v43, 0.0 }
 0x160   :  { %v1247_v33 = vmul.f32 %v1215_v11, %v3593_v6  ;;  %v1217_v12 = vmul.f32 %v2964_v56, %v3750_v37  ;;  %v862_v16 = vsub.f32 %v3803_v28, %v782_v19  ;;  %v1242_v60 = vmul.f32 %v1210_v52, %v3609_v63 }
 0x161   :  { %2969 = vrcp.f32 %v1137_v41  ;;  %v4238_v9 = vrot.slane %v4237_v24, 1  ;;  %v968_v23 = vrot.slane %v967_v40, 1  ;;  %v1093_v2 = vadd.f32 %v1092_v31, %v1091_v49  ;;  %v4241_v31 = vld [vmem:[#allocation36_spill] sm:$0xff] }
 0x162   :  { %v3877_v20 = vpop.eup %2965  ;;  %2971 = vrcp.f32 %v1081_v45  ;;  %v917_v17 = vmul.f32 1.442695, %v862_v16  ;;  %v955_v61 = vadd.f32 %v954_v13, %v3524_v0  ;;  %v1141_v37 = vrot.slane %v1140_v38, 2 }
 0x163   :  { %v948_v35 = vadd.f32 %v4238_v9, %v4237_v24  ;;  %v3880_v6 = vpop.eup %2967  ;;  %v984_v28 = vsel %vm614_vm3, %v3877_v20, 0.0  ;;  %v4239_v63 = vrot.slane %v3607_v58, 4  ;;  %2973 = vrcp.f32 %v4240_v30 }
 0x164   :  { %v1433_v57 = vrot.slane %v3865_v27, 2  ;;  %v1249_v54 = vmul.f32 %v1217_v12, %v3636_v51  ;;  %2975 = vpow2.f32 %v917_v17  ;;  %v985_v47 = vrot.slane %v984_v28, 4 }
 0x165   :  { %v1028_v32 = vadd.f32 %v4239_v63, %v3607_v58  ;;  %v1423_v0 = vsel %vm614_vm3, %v1247_v33, 0.0  ;;  %v3892_v1 = vsel %vm614_vm3, %v1242_v60, 0.0  ;;  %v969_v39 = vadd.f32 %v968_v23, %v967_v40  ;;  %v4243_v33 = vld [vmem:[#allocation37_spill] sm:$0xff] }
 0x166   :  { %2977 = vrcp.f32 %v948_v35  ;;  %v1466_v49 = vrot.slane %v3868_v62, 4  ;;  %v1094_v10 = vrot.slane %v1093_v2, 1  ;;  %v1152_v58 = vsel %vm614_vm3, %v3880_v6, 0.0 }
 0x167   :  { %v986_v18 = vadd.f32 %v985_v47, %v984_v28  ;;  %v2970_v48 = vpop.eup %2969  ;;  %v1142_v15 = vadd.f32 %v1141_v37, %v1140_v38  ;;  %v1010_v51 = vrot.slane %v3596_v14, 1  ;;  %v1029_v43 = vrot.slane %v1028_v32, 2 }
 0x168   :  { %2979 = vrcp.f32 %v955_v61  ;;  %v2972_v11 = vpop.eup %2971  ;;  %v1424_v3 = vrot.slane %v1423_v0, 4  ;;  %v1389_v56 = vrot.slane %v3892_v1, 4  ;;  %v1437_v52 = vsel %vm614_vm3, %v1249_v54, 0.0  ;;  %v4245_v54 = vld [vmem:[#allocation23_spill] sm:$0xff] }
 0x169   :  { %v987_v41 = vrot.slane %v986_v18, 2  ;;  %v2974_v40 = vpop.eup %2973  ;;  %v1153_v45 = vrot.slane %v1152_v58, 4  ;;  %v4242_v19 = vrot.slane %v4241_v31, 1  ;;  %v4244_v38 = vrot.slane %v4243_v33, 2 }
 0x16a   :  { %2981 = vrcp.f32 %v969_v39  ;;  %v3906_v16 = vpop.eup %2975  ;;  %v1219_v60 = vmul.f32 %v2970_v48, %v3768_v53  ;;  %v1095_v24 = vadd.f32 %v1094_v10, %v1093_v2  ;;  %v1143_v23 = vrot.slane %v1142_v15, 1  ;;  %v4246_v10 = vld [vmem:[#allocation24_spill] sm:$0xff] }
 0x16b   :  { %v1004_v13 = vadd.f32 %v4242_v19, %v4241_v31  ;;  %v1016_v12 = vadd.f32 %v4244_v38, %v4243_v33  ;;  %v988_v9 = vadd.f32 %v987_v41, %v986_v18  ;;  %2983 = vrcp.f32 %v3651_v25  ;;  %v4249_v19 = vld [vmem:[#allocation43_spill] sm:$0xff] }
 0x16c   :  { %v2978_v35 = vpop.eup %2977  ;;  %v1096_v17 = vsel %vm614_vm3, %v3906_v16, 0.0  ;;  %v1011_v61 = vadd.f32 %v1010_v51, %v3596_v14  ;;  %v1030_v37 = vadd.f32 %v1029_v43, %v1028_v32  ;;  %v1211_v28 = vmul.f32 %v2972_v11, %v3774_v36  ;;  %v4247_v11 = vld [vmem:[#allocation25_spill] sm:$0xff] }
 0x16d   :  { %v1097_v63 = vrot.slane %v1096_v17, 4  ;;  %v989_v30 = vrot.slane %v988_v9, 1  ;;  %v1191_v47 = vmul.f32 %v2974_v40, %v4245_v54  ;;  %v1154_v53 = vadd.f32 %v1153_v45, %v1152_v58  ;;  %v4248_v58 = vld [vmem:[#allocation14_spill] sm:$0xff] }
 0x16e   :  { %v2980_v39 = vpop.eup %2979  ;;  %v1017_v2 = vrot.slane %v1016_v12, 1  ;;  %2985 = vrcp.f32 %v1004_v13  ;;  %v1192_v25 = vmul.f32 %v2978_v35, %v4246_v10  ;;  %v1251_v18 = vmul.f32 %v1219_v60, %v3666_v55  ;;  %v4250_v55 = vld [vmem:[#allocation16_spill] sm:$0xff]  ;;  %v4251_v35 = vld [vmem:[#allocation26_spill] sm:$0xff] }
 0x16f   :  { %2987 = vrcp.f32 %v1095_v24  ;;  %v1098_v48 = vadd.f32 %v1097_v63, %v1096_v17  ;;  %v990_v41 = vadd.f32 %v989_v30, %v988_v9  ;;  %v1438_v14 = vrot.slane %v1437_v52, 4 }
 0x170   :  { %v2982_v31 = vpop.eup %2981  ;;  %v1144_v32 = vadd.f32 %v1143_v23, %v1142_v15  ;;  %v1031_v51 = vrot.slane %v1030_v37, 1  ;;  %2989 = vrcp.f32 %v1011_v61  ;;  %v1193_v40 = vmul.f32 %v2980_v39, %v4247_v11 }
 0x171   :  { %v2984_v36 = vpop.eup %2983  ;;  %v1099_v43 = vrot.slane %v1098_v48, 2  ;;  %2991 = vrcp.f32 %v990_v41  ;;  %v1223_v45 = vmul.f32 %v1191_v47, %v4248_v58  ;;  %v1243_v13 = vmul.f32 %v1211_v28, %v4249_v19  ;;  %v4252_v28 = vld [vmem:[#allocation30_spill] sm:$0xff]  ;;  %v4253_v47 = vld [vmem:[#allocation13_spill] sm:$0xff] }
 0x172   :  { %v1155_v33 = vrot.slane %v1154_v53, 2  ;;  %v1018_v38 = vadd.f32 %v1017_v2, %v1016_v12  ;;  %v1224_v60 = vmul.f32 %v1192_v25, %v4250_v55  ;;  %v3921_v24 = vadd.f32 %v1424_v3, %v1423_v0 }
 0x173   :  { %v3924_v9 = vsel %vm614_vm3, %v1251_v18, 0.0  ;;  %v1100_v15 = vadd.f32 %v1099_v43, %v1098_v48  ;;  %v1195_v23 = vmul.f32 %v2982_v31, %v4251_v35  ;;  %v3928_v61 = vadd.f32 %v1389_v56, %v3892_v1  ;;  %v4255_v48 = vld [vmem:[#allocation17_spill] sm:$0xff]  ;;  %v4259_v35 = vld [vmem:[#allocation20_spill] sm:$0xff] }
 0x174   :  { %v2986_v17 = vpop.eup %2985  ;;  %v3930_v63 = vadd.f32 %v1438_v14, %v1437_v52  ;;  %v1032_v30 = vadd.f32 %v1031_v51, %v1030_v37  ;;  %v1199_v54 = vmul.f32 %v2984_v36, %v4252_v28  ;;  %2993 = vrcp.f32 %v1144_v32  ;;  %v4254_v37 = vld [vmem:[#allocation31_spill] sm:$0xff]  ;;  %v4256_v32 = vld [vmem:[#allocation18_spill] sm:$0xff] }
 0x175   :  { %v2988_v12 = vpop.eup %2987  ;;  %v1225_v0 = vmul.f32 %v1193_v40, %v4253_v47  ;;  %v1255_v3 = vsel %vm614_vm3, %v1223_v45, 0.0  ;;  %v1262_v39 = vsel %vm614_vm3, %v1224_v60, 0.0  ;;  %v1452_v10 = vrot.slane %v3924_v9, 4  ;;  %v4257_v45 = vld [vmem:[#allocation32_spill] sm:$0xff] }
 0x176   :  { %v2990_v2 = vpop.eup %2989  ;;  %v1395_v25 = vsel %vm614_vm3, %v1243_v13, 0.0  ;;  %v1156_v1 = vadd.f32 %v1155_v33, %v1154_v53  ;;  %2995 = vrcp.f32 %v1018_v38  ;;  %v1101_v52 = vrot.slane %v1100_v15, 1  ;;  %v4258_v13 = vld [vmem:[#allocation21_spill] sm:$0xff]  ;;  %v4260_v47 = vld [vmem:[#allocation44_spill] sm:$0xff] }
 0x177   :  { %v2992_v56 = vpop.eup %2991  ;;  %v1200_v18 = vmul.f32 %v2986_v17, %v4254_v37  ;;  %v1227_v41 = vmul.f32 %v1195_v23, %v4255_v48  ;;  %v1256_v31 = vrot.slane %v1255_v3, 4  ;;  %2997 = vrcp.f32 %v1032_v30  ;;  %v4261_v48 = vld [vmem:[#allocation34_spill] sm:$0xff] }
 0x178   :  { %v1198_v14 = vmul.f32 %v2992_v56, %v3877_v20  ;;  %v1231_v51 = vmul.f32 %v1199_v54, %v4256_v32  ;;  %v1263_v36 = vrot.slane %v1262_v39, 4  ;;  %v1396_v43 = vrot.slane %v1395_v25, 4  ;;  %v4262_v32 = vld [vmem:[#allocation15_spill] sm:$0xff] }
 0x179   :  { %v1213_v11 = vmul.f32 %v2988_v12, %v3800_v42  ;;  %v1257_v40 = vadd.f32 %v1256_v31, %v1255_v3  ;;  %v1269_v53 = vsel %vm614_vm3, %v1225_v0, 0.0  ;;  %v1157_v58 = vrot.slane %v1156_v1, 1 }
 0x17a   :  { %v1201_v19 = vmul.f32 %v2990_v2, %v4257_v45  ;;  %v1230_v33 = vmul.f32 %v1198_v14, %v4258_v13  ;;  %v1264_v38 = vadd.f32 %v1263_v36, %v1262_v39  ;;  %v2994_v55 = vpop.eup %2993  ;;  %v1102_v60 = vadd.f32 %v1101_v52, %v1100_v15  ;;  %v4263_v13 = vld [vmem:[#allocation35_spill] sm:$0xff] }
 0x17b   :  { %v1232_v23 = vmul.f32 %v1200_v18, %v4259_v35  ;;  %v1270_v20 = vrot.slane %v1269_v53, 4  ;;  %v1283_v17 = vsel %vm614_vm3, %v1227_v41, 0.0  ;;  %v1311_v12 = vsel %vm614_vm3, %v1231_v51, 0.0 }
 0x17c   :  { %v2996_v30 = vpop.eup %2995  ;;  %v1265_v28 = vrot.slane %v1264_v38, 2  ;;  %v1284_v54 = vrot.slane %v1283_v17, 4  ;;  %v1304_v42 = vsel %vm614_vm3, %v1230_v33, 0.0  ;;  %v1245_v0 = vmul.f32 %v1213_v11, %v4260_v47  ;;  %v4266_v47 = vld [vmem:[#allocation19_spill] sm:$0xff] }
 0x17d   :  { %v1258_v3 = vrot.slane %v1257_v40, 2  ;;  %v1271_v2 = vadd.f32 %v1270_v20, %v1269_v53  ;;  %v1305_v56 = vrot.slane %v1304_v42, 4  ;;  %v2998_v39 = vpop.eup %2997  ;;  %v1220_v15 = vmul.f32 %v2994_v55, %v3825_v50  ;;  %v4264_v55 = vld [vmem:[#allocation22_spill] sm:$0xff] }
 0x17e   :  { %v1158_v52 = vadd.f32 %v1157_v58, %v1156_v1  ;;  %v1285_v37 = vadd.f32 %v1284_v54, %v1283_v17  ;;  %v1312_v18 = vrot.slane %v1311_v12, 4  ;;  %2999 = vrcp.f32 %v1102_v60  ;;  %v4265_v54 = vld [vmem:[#allocation41_spill] sm:$0xff] }
 0x17f   :  { %v1202_v41 = vmul.f32 %v2996_v30, %v4261_v48  ;;  %v1266_v31 = vadd.f32 %v1265_v28, %v1264_v38  ;;  %v1272_v14 = vrot.slane %v1271_v2, 2  ;;  %v1233_v36 = vmul.f32 %v1201_v19, %v4262_v32 }
 0x180   :  { %v1286_v45 = vrot.slane %v1285_v37, 2  ;;  %v1313_v51 = vadd.f32 %v1312_v18, %v1311_v12  ;;  %v1318_v11 = vsel %vm614_vm3, %v1232_v23, 0.0  ;;  %v1204_v53 = vmul.f32 %v2998_v39, %v4263_v13 }
 0x181   :  { %v1259_v33 = vadd.f32 %v1258_v3, %v1257_v40  ;;  %v1273_v35 = vadd.f32 %v1272_v14, %v1271_v2  ;;  %v1306_v20 = vadd.f32 %v1305_v56, %v1304_v42  ;;  %v1252_v50 = vmul.f32 %v1220_v15, %v3718_v29 }
 0x182   :  { %3001 = vrcp.f32 %v1158_v52  ;;  %v1287_v1 = vadd.f32 %v1286_v45, %v1285_v37  ;;  %v1314_v58 = vrot.slane %v1313_v51, 2  ;;  %v1234_v60 = vmul.f32 %v1202_v41, %v4264_v55 }
 0x183   :  { %v1267_v38 = vrot.slane %v1266_v31, 1  ;;  %v1274_v17 = vrot.slane %v1273_v35, 1  ;;  %v1319_v30 = vrot.slane %v1318_v11, 4  ;;  %v3958_v19 = vadd.f32 %v1396_v43, %v1395_v25 }
 0x184   :  { %v1315_v28 = vadd.f32 %v1314_v58, %v1313_v51  ;;  %v1325_v23 = vsel %vm614_vm3, %v1233_v36, 0.0  ;;  %v1066_v12 = vrot.slane %v4265_v54, 1  ;;  %v3000_v40 = vpop.eup %2999  ;;  %v1236_v42 = vmul.f32 %v1204_v53, %v4266_v47 }
 0x185   :  { %v1260_v3 = vrot.slane %v1259_v33, 1  ;;  %v1288_v29 = vrot.slane %v1287_v1, 1  ;;  %v1307_v2 = vrot.slane %v1306_v20, 2  ;;  %v3964_v56 = vsel %vm614_vm3, %v1245_v0, 0.0 }
 0x186   :  { %v3967_v39 = vsel %vm614_vm3, %v1252_v50, 0.0  ;;  %v1320_v15 = vadd.f32 %v1319_v30, %v1318_v11  ;;  %v1326_v25 = vrot.slane %v1325_v23, 4  ;;  %v1268_v43 = vadd.f32 %v1267_v38, %v1266_v31 }
 0x187   :  { %v1275_v52 = vadd.f32 %v1274_v17, %v1273_v35  ;;  %v1316_v37 = vrot.slane %v1315_v28, 1  ;;  %v1332_v18 = vsel %vm614_vm3, %v1234_v60, 0.0  ;;  %vm1585_vm5 = vcmask 1041409  }
 0x188   :  { %v3002_v48 = vpop.eup %3001  ;;  %v1214_v41 = vmul.f32 %v3000_v40, %v3906_v16  ;;  %v1321_v14 = vrot.slane %v1320_v15, 2  ;;  %v1327_v32 = vadd.f32 %v1326_v25, %v1325_v23  ;;  %v1333_v36 = vrot.slane %v1332_v18, 4 }
 0x189   :  { %vm1587_vm6 = vcmask 1042434   ;;  %v1261_v0 = vadd.f32 %v1260_v3, %v1259_v33  ;;  %v1289_v45 = vadd.f32 %v1288_v29, %v1287_v1  ;;  %v1308_v51 = vadd.f32 %v1307_v2, %v1306_v20 }
 0x18a   :  { %v1346_v13 = vsel %vm614_vm3, %v1236_v42, 0.0  ;;  %v1322_v11 = vadd.f32 %v1321_v14, %v1320_v15  ;;  %v1328_v53 = vrot.slane %v1327_v32, 2  ;;  %v1334_v31 = vadd.f32 %v1333_v36, %v1332_v18 }
 0x18b   :  { %v1347_v35 = vrot.slane %v1346_v13, 4  ;;  %v1222_v50 = vmul.f32 %v3002_v48, %v3880_v6  ;;  %v1317_v58 = vadd.f32 %v1316_v37, %v1315_v28  ;;  %v1480_v55 = vpack.c.bf16 %v1268_v43, %v1268_v43 }
 0x18c   :  { %v1481_v60 = vpack.c.bf16 %v1275_v52, %v1275_v52  ;;  %v1323_v38 = vrot.slane %v1322_v11, 1  ;;  %v1329_v16 = vadd.f32 %v1328_v53, %v1327_v32  ;;  %v1335_v17 = vrot.slane %v1334_v31, 2 }
 0x18d   :  { %v1348_v30 = vadd.f32 %v1347_v35, %v1346_v13  ;;  %v1246_v23 = vmul.f32 %v1214_v41, %v3779_v26  ;;  %v1309_v33 = vrot.slane %v1308_v51, 1  ;;  %v1479_v1 = vpack.c.bf16 %v1261_v0, %v1261_v0  ;;  %v4267_v35 = vld [vmem:[#allocation40_spill] sm:$0xff] }
 0x18e   :  { %v1483_v20 = vpack.c.bf16 %v1289_v45, %v1289_v45  ;;  %v1324_v40 = vadd.f32 %v1323_v38, %v1322_v11  ;;  %v1330_v47 = vrot.slane %v1329_v16, 1  ;;  %v1336_v42 = vadd.f32 %v1335_v17, %v1334_v31  ;;  %v4268_v38 = vld [vmem:[#allocation42_spill] sm:$0xff] }
 0x18f   :  { %v1349_v3 = vrot.slane %v1348_v30, 2  ;;  %v1254_v29 = vmul.f32 %v1222_v50, %v3757_v34  ;;  %v1487_v2 = vpack.c.bf16 %v1317_v58, %v1317_v58  ;;  %v1554_v6 = vunpack.c.l.b16 %v1480_v55 }
 0x190   :  { %v1555_v28 = vunpack.c.l.b16 %v1481_v60  ;;  %v1331_v15 = vadd.f32 %v1330_v47, %v1329_v16  ;;  %v1337_v25 = vrot.slane %v1336_v42, 1  ;;  %v1488_v52 = vpack.c.bf16 %v1324_v40, %v1324_v40 }
 0x191   :  { %v1350_v43 = vadd.f32 %v1349_v3, %v1348_v30  ;;  %v1416_v37 = vsel %vm614_vm3, %v1246_v23, 0.0  ;;  %v1310_v18 = vadd.f32 %v1309_v33, %v1308_v51  ;;  %v1553_v26 = vunpack.c.l.b16 %v1479_v1 }
 0x192   :  { %v1557_v48 = vunpack.c.l.b16 %v1483_v20  ;;  %v1338_v41 = vadd.f32 %v1337_v25, %v1336_v42  ;;  %v1489_v32 = vpack.c.bf16 %v1331_v15, %v1331_v15  ;;  %v1562_v36 = vunpack.c.l.b16 %v1488_v52  ;;  %v4270_v42 = vld [vmem:[#allocation45_spill] sm:$0xff] }
 0x193   :  { %v1351_v14 = vrot.slane %v1350_v43, 1  ;;  %v1561_v0 = vunpack.c.l.b16 %v1487_v2  ;;  %v1586_v45 = vsel %vm1585_vm5, %v1554_v6, %v1553_v26  ;;  %vm1589_vm7 = vcmask 1043459  }
 0x194   :  { %vm1591_vm8 = vcmask 1044484   ;;  %v1490_v13 = vpack.c.bf16 %v1338_v41, %v1338_v41  ;;  %v1563_v11 = vunpack.c.l.b16 %v1489_v32  ;;  %v1588_v53 = vsel %vm1587_vm6, %v1555_v28, %v1586_v45 }
 0x195   :  { %v1352_v34 = vadd.f32 %v1351_v14, %v1350_v43  ;;  %v1486_v31 = vpack.c.bf16 %v1310_v18, %v1310_v18  ;;  %v1590_v51 = vsel %vm1589_vm7, %v4267_v35, %v1588_v53  ;;  %vm1593_vm9 = vcmask 1045509  }
 0x196   :  { %vm1595_vm10 = vcmask 1046534   ;;  %v1564_v58 = vunpack.c.l.b16 %v1490_v13  ;;  %v1592_v55 = vsel %vm1591_vm8, %v1557_v48, %v1590_v51  ;;  %v1599_v60 = vsel %vm1585_vm5, %v1562_v36, %v1561_v0 }
 0x197   :  { %v1492_v50 = vpack.c.bf16 %v1352_v34, %v1352_v34  ;;  %v1594_v16 = vsel %vm1593_vm9, %v4268_v38, %v1592_v55  ;;  %v1600_v17 = vsel %vm1587_vm6, %v1563_v11, %v1599_v60  ;;  %v1067_v30 = vadd.f32 %v1066_v12, %v4265_v54  ;;  %v4273_v34 = vld [vmem:[#allocation38_spill] sm:$0xff]  ;;  %v4275_v60 = vld [vmem:[#allocation39_spill] sm:$0xff] }
 0x198   :  { %v4269_v23 = vrot.slane %v3683_v4, 2  ;;  %v1568_v20 = vunpack.c.l.b16 %v1494_v59  ;;  %v1596_v40 = vsel %vm1595_vm10, %v3843_v22, %v1594_v16  ;;  %v1601_v47 = vsel %vm1589_vm7, %v1564_v58, %v1600_v17 }
 0x199   :  { %v1566_v1 = vunpack.c.l.b16 %v1492_v50  ;;  %vm1597_vm11 = vcmask 1047559   ;;  %v1602_v3 = vsel %vm1591_vm8, %v4270_v42, %v1601_v47  ;;  %3003 = vrcp.f32 %v1067_v30 }
 0x19a   :  { %v1128_v33 = vadd.f32 %v4269_v23, %v3683_v4  ;;  %v1410_v54 = vrot.slane %v3964_v56, 4  ;;  %v1472_v4 = vsel %vm614_vm3, %v1254_v29, 0.0  ;;  %v1560_v12 = vunpack.c.l.b16 %v1486_v31 }
 0x19b   :  { %v1603_v6 = vsel %vm1593_vm9, %v1566_v1, %v1602_v3  ;;  %v1459_v44 = vrot.slane %v3967_v39, 4  ;;  %v1417_v59 = vrot.slane %v1416_v37, 4  ;;  %v1426_v15 = vrot.slane %v3921_v24, 2 }
 0x19c   :  { %v1129_v2 = vrot.slane %v1128_v33, 1  ;;  %v1604_v22 = vsel %vm1595_vm10, %v3770_v8, %v1603_v6  ;;  %v1391_v25 = vrot.slane %v3928_v61, 2  ;;  %v1598_v43 = vsel %vm1597_vm11, %v1560_v12, %v1596_v40 }
 0x19d   :  { %v1605_v52 = vsel %vm1597_vm11, %v1568_v20, %v1604_v22  ;;  %v1440_v29 = vrot.slane %v3930_v63, 2  ;;  %v1473_v18 = vrot.slane %v1472_v4, 4  ;;  %v1453_v48 = vadd.f32 %v1452_v10, %v3924_v9  ;;  %v4271_v9 = vld [vmem:[#allocation46_spill] sm:$0xff]  ;;  %v4276_v20 = vld [vmem:[#allocation28_spill] sm:$0xff] }
 0x19e   :  { %v1130_v28 = vadd.f32 %v1129_v2, %v1128_v33  ;;  %v1620_v26 = vpack.c.b16 %v1605_v52, %v1598_v43  ;;  %v1398_v8 = vrot.slane %v3958_v19, 2  ;;  %v1411_v41 = vadd.f32 %v1410_v54, %v3964_v56 }
 0x19f   :  { %v3004_v14 = vpop.eup %3003  ;;  %v1569_v32 = vunpack.c.l.b16 %v1495_v7  ;;  %v1434_v36 = vadd.f32 %v1433_v57, %v3865_v27  ;;  %v1460_v0 = vadd.f32 %v1459_v44, %v3967_v39  ;;  %v1418_v45 = vadd.f32 %v1417_v59, %v1416_v37  ;;  %v2815_v27 = vld [vmem:[#allocation2 + $0x38] sm:$0xff] }
 0x1a0   :  { %3005 = vrcp.f32 %v1130_v28  ;;  %2559 = vmatmul.msk.bf16.vlgmr.msra.gmra.mxu1 %vm614_vm3, %v1620_v26  ;;  %2561 = vmatmul.msk.bf16.vlgmr.msra.gmra.mxu2 %vm614_vm3, %v1620_v26  ;;  %v4272_v10 = vpack.c.bf16 %v4271_v9, %v4271_v9  ;;  %v1467_v5 = vadd.f32 %v1466_v49, %v3868_v62  ;;  %v1427_v7 = vadd.f32 %v1426_v15, %v3921_v24  ;;  %v2831_v57 = vld [vmem:[#allocation5 + $0x38] sm:$0xff] }
 0x1a1   :  { %v1209_v13 = vmul.f32 %v3004_v14, %v4273_v34  ;;  %v1406_v39 = vadd.f32 %v1405_v21, %v3850_v46  ;;  %v1392_v37 = vadd.f32 %v1391_v25, %v3928_v61  ;;  %v1441_v11 = vadd.f32 %v1440_v29, %v3930_v63  ;;  %v4274_v62 = vld [vmem:[#allocation27_spill] sm:$0xff]  ;;  %1866 = vmatpush.bf16.msra.mxu3 %v2815_v27 }
 0x1a2   :  { %v1570_v56 = vunpack.c.l.b16 %v4272_v10  ;;  %v1474_v53 = vadd.f32 %v1473_v18, %v1472_v4  ;;  %v1454_v31 = vrot.slane %v1453_v48, 2  ;;  %v1399_v35 = vadd.f32 %v1398_v8, %v3958_v19  ;;  %2032 = vmatpush.bf16.msrb.mxu1 %v2831_v57 }
 0x1a3   :  { %v1412_v51 = vrot.slane %v1411_v41, 2  ;;  %v1241_v49 = vmul.f32 %v1209_v13, %v4274_v62  ;;  %v1435_v58 = vrot.slane %v1434_v36, 1  ;;  %v1461_v55 = vrot.slane %v1460_v0, 2 }
 0x1a4   :  { %v4040_v50 = vsel %vm1585_vm5, %v1570_v56, %v1569_v32  ;;  %v1419_v46 = vrot.slane %v1418_v45, 2  ;;  %v1468_v21 = vrot.slane %v1467_v5, 2  ;;  %v1428_v61 = vrot.slane %v1427_v7, 1 }
 0x1a5   :  { %v1381_v38 = vsel %vm614_vm3, %v1241_v49, 0.0  ;;  %v1393_v16 = vrot.slane %v1392_v37, 1  ;;  %v1442_v19 = vrot.slane %v1441_v11, 1  ;;  %v1475_v17 = vrot.slane %v1474_v53, 2 }
 0x1a6   :  { %v3006_v24 = vpop.eup %3005  ;;  %v1382_v30 = vrot.slane %v1381_v38, 4  ;;  %v1455_v23 = vadd.f32 %v1454_v31, %v1453_v48  ;;  %v1400_v33 = vrot.slane %v1399_v35, 1  ;;  %v1413_v1 = vadd.f32 %v1412_v51, %v1411_v41 }
 0x1a7   :  { %v1218_v63 = vmul.f32 %v3006_v24, %v4275_v60  ;;  %v1407_v47 = vrot.slane %v1406_v39, 1  ;;  %v1462_v42 = vadd.f32 %v1461_v55, %v1460_v0  ;;  %v1420_v3 = vadd.f32 %v1419_v46, %v1418_v45 }
 0x1a8   :  { %v1383_v2 = vadd.f32 %v1382_v30, %v1381_v38  ;;  %v1436_v54 = vadd.f32 %v1435_v58, %v1434_v36  ;;  %v1469_v4 = vadd.f32 %v1468_v21, %v1467_v5  ;;  %v1429_v12 = vadd.f32 %v1428_v61, %v1427_v7 }
 0x1a9   :  { %v1250_v40 = vmul.f32 %v1218_v63, %v4276_v20  ;;  %v1394_v44 = vadd.f32 %v1393_v16, %v1392_v37  ;;  %v1476_v59 = vadd.f32 %v1475_v17, %v1474_v53  ;;  %v1443_v15 = vadd.f32 %v1442_v19, %v1441_v11 }
 0x1aa   :  { %v1384_v22 = vrot.slane %v1383_v2, 2  ;;  %v1456_v25 = vrot.slane %v1455_v23, 1  ;;  %v1401_v43 = vadd.f32 %v1400_v33, %v1399_v35  ;;  %v1414_v52 = vrot.slane %v1413_v1, 1 }
 0x1ab   :  { %v1444_v6 = vsel %vm614_vm3, %v1250_v40, 0.0  ;;  %v1463_v29 = vrot.slane %v1462_v42, 1  ;;  %v1421_v18 = vrot.slane %v1420_v3, 1  ;;  %v1408_v8 = vadd.f32 %v1407_v47, %v1406_v39 }
 0x1ac   :  { %v1445_v28 = vrot.slane %v1444_v6, 4  ;;  %v1385_v26 = vadd.f32 %v1384_v22, %v1383_v2  ;;  %v1504_v41 = vpack.c.bf16 %v1436_v54, %v1436_v54  ;;  %v1470_v14 = vrot.slane %v1469_v4, 1 }
 0x1ad   :  { %v1503_v32 = vpack.c.bf16 %v1429_v12, %v1429_v12  ;;  %v1498_v36 = vpack.c.bf16 %v1394_v44, %v1394_v44  ;;  %v1477_v0 = vrot.slane %v1476_v59, 1  ;;  %v1505_v10 = vpack.c.bf16 %v1443_v15, %v1443_v15 }
 0x1ae   :  { %v1446_v48 = vadd.f32 %v1445_v28, %v1444_v6  ;;  %v1386_v45 = vrot.slane %v1385_v26, 1  ;;  %v1457_v56 = vadd.f32 %v1456_v25, %v1455_v23  ;;  %v1499_v5 = vpack.c.bf16 %v1401_v43, %v1401_v43  ;;  %v2814_v25 = vld [vmem:[#allocation2 + $0x30] sm:$0xff] }
 0x1af   :  { %v1415_v7 = vadd.f32 %v1414_v52, %v1413_v1  ;;  %v1464_v34 = vadd.f32 %v1463_v29, %v1462_v42  ;;  %v1422_v13 = vadd.f32 %v1421_v18, %v1420_v3  ;;  %v1500_v37 = vpack.c.bf16 %v1408_v8, %v1408_v8  ;;  %v2830_v43 = vld [vmem:[#allocation5 + $0x30] sm:$0xff]  ;;  %v2823_v52 = vld [vmem:[#allocation2 + $0x78] sm:$0xff]  ;;  %1867 = vmatpush.bf16.msra.mxu3 %v2814_v25  ;;  %v2813_v18 = vld [vmem:[#allocation2 + $0x28] sm:$0xff] }
 0x1b0   :  { %v1447_v9 = vrot.slane %v1446_v48, 2  ;;  %v1387_v27 = vadd.f32 %v1386_v45, %v1385_v26  ;;  %v1578_v11 = vunpack.c.l.b16 %v1504_v41  ;;  %v1471_v53 = vadd.f32 %v1470_v14, %v1469_v4  ;;  %v2839_v29 = vld [vmem:[#allocation5 + $0x78] sm:$0xff]  ;;  %2033 = vmatpush.bf16.msrb.mxu1 %v2830_v43  ;;  %v2829_v26 = vld [vmem:[#allocation5 + $0x28] sm:$0xff]  ;;  %1885 = vmatpush.bf16.msrb.mxu0 %v2823_v52  ;;  %v2838_v8 = vld [vmem:[#allocation5 + $0x70] sm:$0xff] }
 0x1b1   :  { %v1577_v31 = vunpack.c.l.b16 %v1503_v32  ;;  %v1572_v39 = vunpack.c.l.b16 %v1498_v36  ;;  %v1478_v35 = vadd.f32 %v1477_v0, %v1476_v59  ;;  %v1579_v49 = vunpack.c.l.b16 %v1505_v10  ;;  %2051 = vmatpush.bf16.msrb.mxu2 %v2839_v29  ;;  %v2812_v41 = vld [vmem:[#allocation2 + $0x20] sm:$0xff]  ;;  %v2821_v32 = vld [vmem:[#allocation2 + $0x68] sm:$0xff]  ;;  %v2811_v0 = vld [vmem:[#allocation2 + $0x18] sm:$0xff] }
 0x1b2   :  { %v1448_v57 = vadd.f32 %v1447_v9, %v1446_v48  ;;  %v1497_v62 = vpack.c.bf16 %v1387_v27, %v1387_v27  ;;  %v1507_v24 = vpack.c.bf16 %v1457_v56, %v1457_v56  ;;  %v1573_v58 = vunpack.c.l.b16 %v1499_v5  ;;  %v2822_v48 = vld [vmem:[#allocation2 + $0x70] sm:$0xff]  ;;  %v2828_v14 = vld [vmem:[#allocation5 + $0x20] sm:$0xff]  ;;  %v2837_v36 = vld [vmem:[#allocation5 + $0x68] sm:$0xff] }
 0x1b3   :  { %v1501_v55 = vpack.c.bf16 %v1415_v7, %v1415_v7  ;;  %v1508_v46 = vpack.c.bf16 %v1464_v34, %v1464_v34  ;;  %v1502_v21 = vpack.c.bf16 %v1422_v13, %v1422_v13  ;;  %v1574_v63 = vunpack.c.l.b16 %v1500_v37  ;;  %1868 = vmatpush.bf16.msra.mxu3 %v2813_v18  ;;  %v2827_v45 = vld [vmem:[#allocation5 + $0x18] sm:$0xff]  ;;  %v1515_v9 = vld [vmem:[%s4153_s4] sm:$0x3]  ;;  %v2810_v5 = vld [vmem:[#allocation2 + $0x10] sm:$0xff] }
 0x1b4   :  { %v1449_v51 = vrot.slane %v1448_v57, 1  ;;  %v1571_v60 = vunpack.c.l.b16 %v1497_v62  ;;  %v1509_v38 = vpack.c.bf16 %v1471_v53, %v1471_v53  ;;  %v1613_v16 = vsel %vm1585_vm5, %v1578_v11, %v1577_v31  ;;  %2034 = vmatpush.bf16.msrb.mxu1 %v2829_v26  ;;  %1886 = vmatpush.bf16.msrb.mxu0 %v2822_v48  ;;  %v2820_v10 = vld [vmem:[#allocation2 + $0x60] sm:$0xff]  ;;  %v2826_v34 = vld [vmem:[#allocation5 + $0x10] sm:$0xff]  ;;  %v2819_v13 = vld [vmem:[#allocation2 + $0x58] sm:$0xff] }
 0x1b5   :  { %v1510_v19 = vpack.c.bf16 %v1478_v35, %v1478_v35  ;;  %v1614_v23 = vsel %vm1587_vm6, %v1579_v49, %v1613_v16  ;;  %v1581_v33 = vunpack.c.l.b16 %v1507_v24  ;;  %v1575_v1 = vunpack.c.l.b16 %v1501_v55  ;;  %2052 = vmatpush.bf16.msrb.mxu2 %v2838_v8  ;;  %v2836_v56 = vld [vmem:[#allocation5 + $0x60] sm:$0xff]  ;;  %v2835_v27 = vld [vmem:[#allocation5 + $0x58] sm:$0xff]  ;;  %v2809_v37 = vld [vmem:[#allocation2 + $0x8] sm:$0xff] }
 0x1b6   :  { %v1450_v61 = vadd.f32 %v1449_v51, %v1448_v57  ;;  %v1607_v30 = vsel %vm1587_vm6, %v1571_v60, %v4040_v50  ;;  %v1582_v40 = vunpack.c.l.b16 %v1508_v46  ;;  %v1576_v47 = vunpack.c.l.b16 %v1502_v21  ;;  %v2825_v11 = vld [vmem:[#allocation5 + $0x8] sm:$0xff]  ;;  %v2818_v31 = vld [vmem:[#allocation2 + $0x50] sm:$0xff]  ;;  %v2808_v62 = vld [vmem:[#allocation2] sm:$0xff] }
 0x1b7   :  { %v1608_v20 = vsel %vm1589_vm7, %v1572_v39, %v1607_v30  ;;  %v1584_v2 = vunpack.c.l.b16 %v1510_v19  ;;  %v1583_v12 = vunpack.c.l.b16 %v1509_v38  ;;  %1869 = vmatpush.bf16.msra.mxu3 %v2812_v41  ;;  %v4065_v7 = vperm.slane %v1515_v9, 0  ;;  %v2834_v39 = vld [vmem:[#allocation5 + $0x50] sm:$0xff]  ;;  %v2824_v49 = vld [vmem:[#allocation5] sm:$0xff]  ;;  %v2833_v55 = vld [vmem:[#allocation5 + $0x48] sm:$0xff] }
 0x1b8   :  { %v1506_v17 = vpack.c.bf16 %v1450_v61, %v1450_v61  ;;  %v1609_v3 = vsel %vm1591_vm8, %v1573_v58, %v1608_v20  ;;  %2035 = vmatpush.bf16.msrb.mxu1 %v2828_v14  ;;  %1887 = vmatpush.bf16.msrb.mxu0 %v2821_v32  ;;  %v4068_v51 = vperm.slane %v1515_v9, 1  ;;  %v2817_v58 = vld [vmem:[#allocation2 + $0x48] sm:$0xff]  ;;  %v2816_v38 = vld [vmem:[#allocation2 + $0x40] sm:$0xff]  ;;  %v2854_v29 = vld [vmem:[#allocation7 + $0x70] sm:$0xff]  ;;  %vm2297_vm5 = vcmask 1040384  }
 0x1b9   :  { %v1610_v54 = vsel %vm1593_vm9, %v1574_v63, %v1609_v3  ;;  %2053 = vmatpush.bf16.msrb.mxu2 %v2837_v36  ;;  %v2832_v16 = vld [vmem:[#allocation5 + $0x40] sm:$0xff]  ;;  %v2845_v52 = vld [vmem:[#allocation7 + $0x28] sm:$0xff]  ;;  %v2843_v32 = vld [vmem:[#allocation7 + $0x18] sm:$0xff] }
 0x1ba   :  { %v1580_v42 = vunpack.c.l.b16 %v1506_v17  ;;  %v1611_v6 = vsel %vm1595_vm10, %v1575_v1, %v1610_v54  ;;  %v2847_v54 = vld [vmem:[#allocation7 + $0x38] sm:$0xff]  ;;  %v2844_v48 = vld [vmem:[#allocation7 + $0x20] sm:$0xff]  ;;  %v2853_v8 = vld [vmem:[#allocation7 + $0x68] sm:$0xff] }
 0x1bb   :  { %v1612_v44 = vsel %vm1597_vm11, %v1576_v47, %v1611_v6  ;;  %1870 = vmatpush.bf16.msra.mxu3 %v2811_v0  ;;  %v2852_v36 = vld [vmem:[#allocation7 + $0x60] sm:$0xff] }
 0x1bc   :  { %v1615_v4 = vsel %vm1589_vm7, %v1580_v42, %v1614_v23  ;;  %2036 = vmatpush.bf16.msrb.mxu1 %v2827_v45  ;;  %1888 = vmatpush.bf16.msrb.mxu0 %v2820_v10  ;;  %vm2330_vm7 = vcmask 1046528  }
 0x1bd   :  { %v1616_v50 = vsel %vm1591_vm8, %v1581_v33, %v1615_v4  ;;  %2054 = vmatpush.bf16.msrb.mxu2 %v2836_v56 }
 0x1be   :  { %v1617_v59 = vsel %vm1593_vm9, %v1582_v40, %v1616_v50 }
 0x1bf   :  { %v1618_v22 = vsel %vm1595_vm10, %v1583_v12, %v1617_v59  ;;  %1871 = vmatpush.bf16.msra.mxu3 %v2810_v5  ;;  %v2842_v5 = vld [vmem:[#allocation7 + $0x10] sm:$0xff] }
 0x1c0   :  { %v1619_v28 = vsel %vm1597_vm11, %v1584_v2, %v1618_v22  ;;  %2037 = vmatpush.bf16.msrb.mxu1 %v2826_v34  ;;  %1889 = vmatpush.bf16.msrb.mxu0 %v2819_v13  ;;  %v2846_v22 = vld [vmem:[#allocation7 + $0x30] sm:$0xff]  ;;  %v2851_v34 = vld [vmem:[#allocation7 + $0x58] sm:$0xff] }
 0x1c1   :  { %v1621_v15 = vpack.c.b16 %v1619_v28, %v1612_v44  ;;  %2055 = vmatpush.bf16.msrb.mxu2 %v2835_v27  ;;  %v2855_v28 = vld [vmem:[#allocation7 + $0x78] sm:$0xff] }
 0x1c3   :  { %2560 = vmatmul.msk.bf16.gmra.mxu1 %vm614_vm3, %v1621_v15  ;;  %2562 = vmatmul.msk.bf16.gmra.mxu2 %vm614_vm3, %v1621_v15 }
 0x1c4   :  { %1872 = vmatpush.bf16.msra.mxu3 %v2809_v37  ;;  %2038 = vmatpush.bf16.msrb.mxu1 %v2825_v11  ;;  %v2841_v11 = vld [vmem:[#allocation7 + $0x8] sm:$0xff] }
 0x1c5   :  { %1890 = vmatpush.bf16.msrb.mxu0 %v2818_v31  ;;  %2056 = vmatpush.bf16.msrb.mxu2 %v2834_v39 }
 0x1c8   :  { %1873 = vmatpush.bf16.msra.mxu3 %v2808_v62  ;;  %2039 = vmatpush.bf16.msrb.mxu1 %v2824_v49  ;;  %v2849_v62 = vld [vmem:[#allocation7 + $0x48] sm:$0xff] }
 0x1c9   :  { %1891 = vmatpush.bf16.msrb.mxu0 %v2817_v58  ;;  %2057 = vmatpush.bf16.msrb.mxu2 %v2833_v55 }
 0x1cc   :  { %2198 = vmatpush.bf16.msrb.mxu3 %v2847_v54 }
 0x1cd   :  { %1892 = vmatpush.bf16.msrb.mxu0 %v2816_v38  ;;  %2058 = vmatpush.bf16.msrb.mxu2 %v2832_v16 }
 0x1d0   :  { %2199 = vmatpush.bf16.msrb.mxu3 %v2846_v22  ;;  %v4277_v22 = vld [vmem:[#allocation12_spill] sm:$0xff] }
 0x1d1   :  { %2217 = vmatpush.bf16.msra.mxu0 %v2855_v28  ;;  %v2245_v28 = vand.u32 15, %v4277_v22 }
 0x1d3   :  { %vm2289_vm6 = vcmp.eq.s32.totalorder %v2245_v28, 0 }
 0x1d4   :  { %2200 = vmatpush.bf16.msrb.mxu3 %v2845_v52 }
 0x1d5   :  { %2218 = vmatpush.bf16.msra.mxu0 %v2854_v29 }
 0x1d8   :  { %2201 = vmatpush.bf16.msrb.mxu3 %v2844_v48 }
 0x1d9   :  { %2219 = vmatpush.bf16.msra.mxu0 %v2853_v8  ;;  %v2238_v8 = vadd.s32 8, %v4277_v22 }
 0x1dc   :  { %2202 = vmatpush.bf16.msrb.mxu3 %v2843_v32  ;;  %v2863_v32 = vld [vmem:[%s4158_s9 + $0x38] sm:$0xff] }
 0x1dd   :  { %2220 = vmatpush.bf16.msra.mxu0 %v2852_v36  ;;  %2468 = vmatpush.bf16.msra.mxu1 %v2863_v32  ;;  %v2857_v32 = vld [vmem:[%s4158_s9 + $0x8] sm:$0xff] }
 0x1e0   :  { %2203 = vmatpush.bf16.msrb.mxu3 %v2842_v5 }
 0x1e1   :  { %2221 = vmatpush.bf16.msra.mxu0 %v2851_v34  ;;  %v2252_v34 = vand.u32 15, %v2238_v8 }
 0x1e3   :  { %vm2323_vm8 = vcmp.eq.s32.totalorder %v2252_v34, 15 }
 0x1e4   :  { %2204 = vmatpush.bf16.msrb.mxu3 %v2841_v11 }
 0x21d   :  { %v1657_v57 = vpop.f32.mrf.mxu1 }
 0x21e   :  { %v1658_v53 = vadd.f32 %v1657_v57, %v4065_v7 }
 0x220   :  { %v1694_v35 = vmin.f32 %v1658_v53, 0.0  ;;  %vm1686_vm12 = vcmp.gt.f32.partialorder %v1658_v53, 0.0 }
 0x222   :  { %v1702_v46 = vmul.f32 1.442695, %v1694_v35 }
 0x223   :  { %v1676_v24 = vpop.f32.mrf.mxu2 }
 0x224   :  { %v1677_v21 = vadd.f32 %v1676_v24, %v4068_v51  ;;  %3007 = vpow2.f32 %v1702_v46  ;;  %v2848_v46 = vld [vmem:[#allocation7 + $0x40] sm:$0xff] }
 0x225   :  { %v1659_v61 = vpop.f32.mrf.mxu1 }
 0x226   :  { %v1695_v60 = vmin.f32 %v1677_v21, 0.0  ;;  %v1660_v63 = vadd.f32 %v1659_v61, %v4065_v7  ;;  %vm1687_vm14 = vcmp.gt.f32.partialorder %v1677_v21, 0.0 }
 0x228   :  { %v1696_v19 = vmin.f32 %v1660_v63, 0.0  ;;  %v1704_v17 = vmul.f32 1.442695, %v1695_v60  ;;  %vm1688_vm13 = vcmp.gt.f32.partialorder %v1660_v63, 0.0 }
 0x22a   :  { %v1706_v30 = vmul.f32 1.442695, %v1696_v19  ;;  %v3008_v1 = vpop.eup %3007 }
 0x22b   :  { %v1678_v23 = vpop.f32.mrf.mxu2  ;;  %v2563_v47 = vadd.f32 -1.0, %v3008_v1 }
 0x22c   :  { %3009 = vpow2.f32 %v1706_v30  ;;  %v1679_v33 = vadd.f32 %v1678_v23, %v4068_v51 }
 0x22d   :  { %3011 = vpow2.f32 %v1704_v17  ;;  %v1726_v4 = vsel %vm1686_vm12, %v1658_v53, %v2563_v47  ;;  %v2850_v53 = vld [vmem:[#allocation7 + $0x50] sm:$0xff] }
 0x22e   :  { %v1697_v20 = vmin.f32 %v1679_v33, 0.0  ;;  %vm1689_vm15 = vcmp.gt.f32.partialorder %v1679_v33, 0.0  ;;  %2222 = vmatpush.bf16.msra.mxu0 %v2850_v53  ;;  %v2876_v53 = vld [vmem:[%s4157_s8] ss:$0 sm:$0xff] }
 0x230   :  { %v1708_v40 = vmul.f32 1.442695, %v1697_v20 }
 0x232   :  { %v3010_v42 = vpop.eup %3009  ;;  %3013 = vpow2.f32 %v1708_v40  ;;  %2223 = vmatpush.bf16.msra.mxu0 %v2849_v62 }
 0x233   :  { %v2565_v3 = vadd.f32 -1.0, %v3010_v42  ;;  %v3012_v2 = vpop.eup %3011 }
 0x234   :  { %v2564_v50 = vadd.f32 -1.0, %v3012_v2 }
 0x235   :  { %v1728_v12 = vsel %vm1688_vm13, %v1660_v63, %v2565_v3 }
 0x236   :  { %v4073_v6 = vpack.c.bf16 %v1728_v12, %v1726_v4  ;;  %v1727_v15 = vsel %vm1687_vm14, %v1677_v21, %v2564_v50  ;;  %2224 = vmatpush.bf16.msra.mxu0 %v2848_v46 }
 0x238   :  { %v3014_v44 = vpop.eup %3013  ;;  %1874 = vmatmul.bf16.vlgmr.msra.gmra.mxu3 %v4073_v6  ;;  %2040 = vmatmul.bf16.vlgmr.msrb.gmra.mxu1 %v4073_v6 }
 0x239   :  { %v2566_v59 = vadd.f32 -1.0, %v3014_v44 }
 0x23b   :  { %v1729_v25 = vsel %vm1689_vm15, %v1679_v33, %v2566_v59 }
 0x23c   :  { %v4077_v43 = vpack.c.bf16 %v1729_v25, %v1727_v15 }
 0x23e   :  { %1893 = vmatmul.bf16.vlgmr.msrb.gmra.mxu0 %v4077_v43  ;;  %2059 = vmatmul.bf16.vlgmr.msrb.gmra.mxu2 %v4077_v43 }
 0x240   :  { %v1662_v18 = vpop.f32.mrf.mxu1 }
 0x241   :  { %v1663_v26 = vadd.f32 %v1662_v18, %v4065_v7 }
 0x243   :  { %v1698_v41 = vmin.f32 %v1663_v26, 0.0  ;;  %vm1690_vm0 = vcmp.gt.f32.partialorder %v1663_v26, 0.0 }
 0x245   :  { %v1710_v0 = vmul.f32 1.442695, %v1698_v41 }
 0x246   :  { %v1681_v14 = vpop.f32.mrf.mxu2 }
 0x247   :  { %v1682_v45 = vadd.f32 %v1681_v14, %v4068_v51  ;;  %3015 = vpow2.f32 %v1710_v0 }
 0x248   :  { %v1664_v9 = vpop.f32.mrf.mxu1 }
 0x249   :  { %v1699_v10 = vmin.f32 %v1682_v45, 0.0  ;;  %v1665_v56 = vadd.f32 %v1664_v9, %v4065_v7  ;;  %v2840_v7 = vld [vmem:[#allocation7] sm:$0xff]  ;;  %vm1691_vm2 = vcmp.gt.f32.partialorder %v1682_v45, 0.0 }
 0x24a   :  { %2205 = vmatpush.bf16.msrb.mxu3 %v2840_v7  ;;  %v2861_v7 = vld [vmem:[%s4158_s9 + $0x28] sm:$0xff] }
 0x24b   :  { %v1700_v13 = vmin.f32 %v1665_v56, 0.0  ;;  %v1712_v27 = vmul.f32 1.442695, %v1699_v10  ;;  %vm1692_vm1 = vcmp.gt.f32.partialorder %v1665_v56, 0.0  ;;  %v2862_v10 = vld [vmem:[%s4158_s9 + $0x30] sm:$0xff] }
 0x24c   :  { %2469 = vmatpush.bf16.msra.mxu1 %v2862_v10 }
 0x24d   :  { %v1714_v57 = vmul.f32 1.442695, %v1700_v13  ;;  %v3016_v39 = vpop.eup %3015 }
 0x24e   :  { %v1683_v37 = vpop.f32.mrf.mxu2  ;;  %v2567_v24 = vadd.f32 -1.0, %v3016_v39 }
 0x24f   :  { %3017 = vpow2.f32 %v1714_v57  ;;  %v1684_v31 = vadd.f32 %v1683_v37, %v4068_v51 }
 0x250   :  { %3019 = vpow2.f32 %v1712_v27  ;;  %v1730_v61 = vsel %vm1690_vm0, %v1663_v26, %v2567_v24  ;;  %v2240_v24 = vadd.s32 24, %v4277_v22  ;;  %2470 = vmatpush.bf16.msra.mxu1 %v2861_v7  ;;  %vm2521_vm0 = vcmask 517120  }
 0x251   :  { %v1701_v35 = vmin.f32 %v1684_v31, 0.0  ;;  %vm1693_vm4 = vcmp.gt.f32.partialorder %v1684_v31, 0.0 }
 0x253   :  { %v1716_v49 = vmul.f32 1.442695, %v1701_v35 }
 0x255   :  { %v3018_v58 = vpop.eup %3017  ;;  %3021 = vpow2.f32 %v1716_v49 }
 0x256   :  { %v2569_v55 = vadd.f32 -1.0, %v3018_v58  ;;  %v3020_v21 = vpop.eup %3019 }
 0x257   :  { %v2568_v63 = vadd.f32 -1.0, %v3020_v21 }
 0x258   :  { %v1732_v51 = vsel %vm1692_vm1, %v1665_v56, %v2569_v55 }
 0x259   :  { %v1736_v60 = vpack.c.bf16 %v1732_v51, %v1730_v61  ;;  %v1731_v19 = vsel %vm1691_vm2, %v1682_v45, %v2568_v63  ;;  %v2239_v45 = vadd.s32 16, %v4277_v22  ;;  %v2860_v63 = vld [vmem:[%s4158_s9 + $0x20] sm:$0xff] }
 0x25a   :  { %2471 = vmatpush.bf16.msra.mxu1 %v2860_v63 }
 0x25b   :  { %v3022_v38 = vpop.eup %3021  ;;  %1879 = vmatmul.bf16.gmra.mxu3 %v1736_v60  ;;  %2045 = vmatmul.bf16.gmra.mxu1 %v1736_v60  ;;  %v2259_v39 = vand.u32 15, %v2239_v45 }
 0x25c   :  { %v2570_v16 = vadd.f32 -1.0, %v3022_v38 }
 0x25d   :  { %vm4110_vm9 = vcmp.eq.s32.totalorder %v2259_v39, 0 }
 0x25e   :  { %v1733_v17 = vsel %vm1693_vm4, %v1684_v31, %v2570_v16 }
 0x25f   :  { %v1737_v30 = vpack.c.bf16 %v1733_v17, %v1731_v19 }
 0x261   :  { %1898 = vmatmul.bf16.gmra.mxu0 %v1737_v30  ;;  %2064 = vmatmul.bf16.gmra.mxu2 %v1737_v30 }
 0x26b   :  { %2206 = vmatmul.bf16.vlgmr.msrb.gmra.mxu3 %v4073_v6 }
 0x271   :  { %2225 = vmatmul.bf16.vlgmr.msra.gmra.mxu0 %v4077_v43 }
 0x27b   :  { %2211 = vmatmul.bf16.gmra.mxu3 %v1736_v60 }
 0x281   :  { %2230 = vmatmul.bf16.gmra.mxu0 %v1737_v30  ;;  %v2266_v30 = vand.u32 15, %v2240_v24 }
 0x283   :  { %vm2325_vm12 = vcmp.eq.s32.totalorder %v2266_v30, 15 }
 0x2b5   :  { %v2041_v54 = vpop.f32.mrf.mxu1 }
 0x2bb   :  { %v1875_v23 = vpop.f32.mrf.mxu3  ;;  %v1894_v33 = vpop.f32.mrf.mxu0 }
 0x2bc   :  { %v1895_v50 = vadd.f32 %v1894_v33, %v1875_v23 }
 0x2bd   :  { %v2043_v59 = vpop.f32.mrf.mxu1 }
 0x2be   :  { %v2298_v6 = vrot.slane %v1895_v50, 7 }
 0x2c0   :  { %v2309_v29 = vsel %vm2297_vm5, 0.0, %v2298_v6 }
 0x2c1   :  { %v2060_v2 = vpop.f32.mrf.mxu2  ;;  %v2318_v0 = vsel %vm2289_vm6, 0.0, %v2309_v29 }
 0x2c2   :  { %v2061_v18 = vadd.f32 %v2060_v2, %v2041_v54 }
 0x2c3   :  { %v1877_v1 = vpop.f32.mrf.mxu3  ;;  %v1896_v20 = vpop.f32.mrf.mxu0 }
 0x2c4   :  { %v1897_v41 = vadd.f32 %v1896_v20, %v1877_v1  ;;  %v2355_v56 = vadd.f32 %v2318_v0, %v2061_v18  ;;  %v2858_v18 = vld [vmem:[%s4158_s9 + $0x10] sm:$0xff] }
 0x2c6   :  { %v2299_v13 = vrot.slane %v1897_v41, 7 }
 0x2c8   :  { %v2300_v58 = vsel %vm2297_vm5, %v2298_v6, %v2299_v13 }
 0x2c9   :  { %v2062_v44 = vpop.f32.mrf.mxu2 }
 0x2ca   :  { %v2063_v37 = vadd.f32 %v2062_v44, %v2043_v59  ;;  %v2864_v44 = vld [vmem:[%s4160_s11] sm:$0xff] }
 0x2cc   :  { %v2356_v55 = vadd.f32 %v2300_v58, %v2063_v37 }
 0x2d8   :  { %v2046_v36 = vpop.f32.mrf.mxu1 }
 0x2de   :  { %v1880_v40 = vpop.f32.mrf.mxu3  ;;  %v1899_v47 = vpop.f32.mrf.mxu0 }
 0x2df   :  { %v1900_v5 = vadd.f32 %v1899_v47, %v1880_v40 }
 0x2e0   :  { %v2048_v38 = vpop.f32.mrf.mxu1 }
 0x2e1   :  { %v2301_v62 = vrot.slane %v1900_v5, 7 }
 0x2e3   :  { %v2302_v19 = vsel %vm2297_vm5, %v2299_v13, %v2301_v62 }
 0x2e4   :  { %v2065_v26 = vpop.f32.mrf.mxu2  ;;  %v2320_v2 = vsel %vm4110_vm9, 0.0, %v2302_v19 }
 0x2e5   :  { %v2066_v23 = vadd.f32 %v2065_v26, %v2046_v36 }
 0x2e6   :  { %v1882_v42 = vpop.f32.mrf.mxu3  ;;  %v1901_v3 = vpop.f32.mrf.mxu0 }
 0x2e7   :  { %v1902_v35 = vadd.f32 %v1901_v3, %v1882_v42  ;;  %v2865_v3 = vld [vmem:[%s4160_s11 + $0x8] sm:$0xff]  ;;  %v2357_v59 = vadd.f32 %v2320_v2, %v2066_v23 }
 0x2e8   :  { %2514 = vmatpush.bf16.msra.mxu2 %v2865_v3 }
 0x2e9   :  { %v2303_v51 = vrot.slane %v1902_v35, 7 }
 0x2eb   :  { %v2304_v54 = vsel %vm2297_vm5, %v2301_v62, %v2303_v51  ;;  %v2878_v51 = vld [vmem:[%s4161_s12] ss:$0 sm:$0xff] }
 0x2ec   :  { %v2067_v46 = vpop.f32.mrf.mxu2  ;;  %2515 = vmatpush.bf16.msra.mxu2 %v2864_v44 }
 0x2ed   :  { %v2068_v33 = vadd.f32 %v2067_v46, %v2048_v38 }
 0x2ee   :  { %v2207_v4 = vpop.f32.mrf.mxu3  ;;  %v2226_v12 = vpop.f32.mrf.mxu0 }
 0x2ef   :  { %v2227_v15 = vadd.f32 %v2226_v12, %v2207_v4  ;;  %v2859_v4 = vld [vmem:[%s4158_s9 + $0x18] sm:$0xff]  ;;  %v2358_v6 = vadd.f32 %v2304_v54, %v2068_v33 }
 0x2f0   :  { %2472 = vmatpush.bf16.msra.mxu1 %v2859_v4 }
 0x2f1   :  { %v2331_v14 = vrot.slane %v2227_v15, 1 }
 0x2f4   :  { %2473 = vmatpush.bf16.msra.mxu1 %v2858_v18 }
 0x2f6   :  { %v2209_v25 = vpop.f32.mrf.mxu3  ;;  %v2228_v43 = vpop.f32.mrf.mxu0 }
 0x2f7   :  { %v2229_v52 = vadd.f32 %v2228_v43, %v2209_v25 }
 0x2f8   :  { %2474 = vmatpush.bf16.msra.mxu1 %v2857_v32 }
 0x2f9   :  { %v2332_v48 = vrot.slane %v2229_v52, 1 }
 0x2fb   :  { %v2333_v9 = vsel %vm2330_vm7, %v2331_v14, %v2332_v48 }
 0x2fc   :  { %v2359_v11 = vadd.f32 %v2355_v56, %v2333_v9  ;;  %v2856_v56 = vld [vmem:[%s4158_s9] sm:$0xff] }
 0x2fd   :  { %2475 = vmatpush.bf16.msra.mxu1 %v2856_v56 }
 0x2fe   :  { %v2212_v27 = vpop.f32.mrf.mxu3  ;;  %v2231_v57 = vpop.f32.mrf.mxu0  ;;  %v2367_v21 = vadd.f32 %v2876_v53, %v2359_v11 }
 0x2ff   :  { %v2232_v31 = vadd.f32 %v2231_v57, %v2212_v27 }
 0x300   :  { %v2375_v40 = vmul.f32 0.01, %v2367_v21  ;;  %vm2371_vm10 = vcmp.ge.f32.partialorder %v2367_v21, 0.0 }
 0x301   :  { %v2334_v49 = vrot.slane %v2232_v31, 1 }
 0x302   :  { %v2379_v22 = vsel %vm2371_vm10, %v2367_v21, %v2375_v40 }
 0x303   :  { %v2335_v61 = vsel %vm2330_vm7, %v2332_v48, %v2334_v49 }
 0x304   :  { %v2352_v60 = vsel %vm2323_vm8, 0.0, %v2335_v61 }
 0x305   :  { %v2360_v17 = vadd.f32 %v2356_v55, %v2352_v60 }
 0x306   :  { %v2214_v1 = vpop.f32.mrf.mxu3  ;;  %v2233_v20 = vpop.f32.mrf.mxu0 }
 0x307   :  { %v2368_v47 = vadd.f32 %v2876_v53, %v2360_v17  ;;  %v2234_v42 = vadd.f32 %v2233_v20, %v2214_v1 }
 0x309   :  { %vm2372_vm11 = vcmp.ge.f32.partialorder %v2368_v47, 0.0  ;;  %v2376_v12 = vmul.f32 0.01, %v2368_v47  ;;  %v2336_v50 = vrot.slane %v2234_v42, 1 }
 0x30b   :  { %v2380_v28 = vsel %vm2372_vm11, %v2368_v47, %v2376_v12  ;;  %v2337_v15 = vsel %vm2330_vm7, %v2334_v49, %v2336_v50  ;;  %v2342_v25 = vsel %vm2330_vm7, %v2336_v50, 0.0  ;;  %v2877_v49 = vld [vmem:[%s4159_s10] ss:$0 sm:$0xff] }
 0x30c   :  { %v2383_v43 = vadd.f32 %v2380_v28, %v2379_v22  ;;  %v2354_v52 = vsel %vm2325_vm12, 0.0, %v2342_v25  ;;  %v2361_v29 = vadd.f32 %v2357_v59, %v2337_v15 }
 0x30d   :  { %v2362_v26 = vadd.f32 %v2358_v6, %v2354_v52 }
 0x30e   :  { %v2384_v48 = vrot.slane %v2383_v43, 4  ;;  %v2369_v8 = vadd.f32 %v2876_v53, %v2361_v29 }
 0x30f   :  { %v2370_v41 = vadd.f32 %v2876_v53, %v2362_v26 }
 0x310   :  { %vm2373_vm13 = vcmp.ge.f32.partialorder %v2369_v8, 0.0  ;;  %v2377_v14 = vmul.f32 0.01, %v2369_v8  ;;  %v2385_v36 = vadd.f32 %v2384_v48, %v2383_v43 }
 0x311   :  { %vm2374_vm14 = vcmp.ge.f32.partialorder %v2370_v41, 0.0  ;;  %v2378_v0 = vmul.f32 0.01, %v2370_v41 }
 0x312   :  { %v2381_v45 = vsel %vm2373_vm13, %v2369_v8, %v2377_v14  ;;  %v2386_v5 = vrot.slane %v2385_v36, 2 }
 0x313   :  { %v2382_v9 = vsel %vm2374_vm14, %v2370_v41, %v2378_v0 }
 0x314   :  { %v2390_v10 = vadd.f32 %v2382_v9, %v2381_v45  ;;  %v2387_v27 = vadd.f32 %v2386_v5, %v2385_v36 }
 0x316   :  { %v2391_v34 = vrot.slane %v2390_v10, 4  ;;  %v2388_v37 = vrot.slane %v2387_v27, 1 }
 0x318   :  { %v2392_v13 = vadd.f32 %v2391_v34, %v2390_v10  ;;  %v2389_v31 = vadd.f32 %v2388_v37, %v2387_v27 }
 0x31a   :  { %v2393_v57 = vrot.slane %v2392_v13, 2 }
 0x31c   :  { %v2394_v11 = vadd.f32 %v2393_v57, %v2392_v13 }
 0x31e   :  { %v2395_v53 = vrot.slane %v2394_v11, 1 }
 0x320   :  { %v2396_v39 = vadd.f32 %v2395_v53, %v2394_v11 }
 0x322   :  { %v2397_v35 = vsel %vm2297_vm5, %v2389_v31, %v2396_v39 }
 0x323   :  { %v2398_v7 = vmul.f32 0.0625, %v2397_v35 }
 0x325   :  { %v2399_v62 = vpack.c.bf16 %v2398_v7, %v2398_v7 }
 0x327   :  { %2476 = vmatmul.bf16.vlgmr.msra.gmra.mxu1 %v2399_v62 }
 0x3a4   :  { %v2477_v24 = vpop.f32.mrf.mxu1 }
 0x3a5   :  { %v2478_v58 = vadd.f32 %v2877_v49, %v2477_v24 }
 0x3a7   :  { %vm2481_vm15 = vcmp.ge.f32.partialorder %v2478_v58, 0.0  ;;  %v2482_v55 = vmul.f32 0.01, %v2478_v58 }
 0x3a9   :  { %v2483_v46 = vsel %vm2481_vm15, %v2478_v58, %v2482_v55 }
 0x3aa   :  { %v2484_v21 = vpack.c.bf16 %v2483_v46, %v2483_v46 }
 0x3ac   :  { %v2479_v61 = vpop.f32.mrf.mxu1  ;;  %2803 = vmatmul.msk.bf16.vlgmr.msra.gmra.mxu2 %vm614_vm3, %v2484_v21 }
 0x42f   :  { %v2517_v60 = vpop.f32.mrf.mxu2 }
 0x430   :  { %v2518_v63 = vadd.f32 %v2878_v51, %v2517_v60 }
 0x432   :  { %2522 = vst.msk [vmem:[#allocation8] sm:$0x3] %vm2521_vm0, %v2518_v63 }
 0x433   :  { %2533 = dma.vmem_to_hbm [thread:$0]  %s2529_s28, 32, %s2531_s30, [#allocation4]  }
 0x437   :  { %v2519_v38 = vpop.f32.mrf.mxu2 }
 0x438   :  { %3124 = dma.done.wait [#allocation4], 32  }
 0x439   :  { %3125 = vsyncadd [#allocation4], 4294967264 }
 0x43a   :  { %2538 = vsyncpa [#allocation3], 1 }
 0x43b   :  { %2539 = vsyncpa [#allocation6], 1 }
 0x43c   :  { %2540 = vsyncpa [#allocation4], 1 }

</bundles_post_ra>
